<compile_context>
chip_gen: v7x
topology: tpu7x:2x2x1
jax: 0.10.0
libtpu: 0.0.40
codegen_flags: <defaults>
</compile_context>

<pallas_src>
import jax
import jax.numpy as jnp
from jax.experimental import pallas as pl
from jax.experimental.pallas import tpu as pltpu

_MIB = 1024 * 1024


def _softmax_last(x):
    """Numerically-stable softmax over the last (lane) axis of a 2-D tile."""
    m = jnp.max(x, axis=-1, keepdims=True)
    e = jnp.exp(x - m)
    s = jnp.sum(e, axis=-1, keepdims=True)
    r = pl.reciprocal(s, approx=True)      # EUP slot, essentially free next to exp
    r = r * (2.0 - s * r)                  # one Newton step -> ~fp32 accuracy
    return e * r


# ----------------------------- kernels ------------------------------------ #
# Per grid step (one tile of TB batch rows):
#   q_ref   : (TB, H)      query rows (hidden, or hidden@W for 'general')
#   enc_ref : (S, TB, H)   encoder outputs, native (S, B, H) layout slice
#   out_ref : (TB, S)      softmaxed attention weights (lane-dense in S)


def _dot_kernel(q_ref, enc_ref, out_ref):
    q = q_ref[...]                                           # (TB, H) f32
    enc = enc_ref[...].astype(jnp.float32)                   # per-tile upcast
    # scores[s, b] = sum_h q[b, h] * enc[s, b, h]   (VPU mul + lane reduce)
    scores_sb = jnp.sum(enc * q[None, :, :], axis=-1)        # (S, TB)
    out_ref[...] = _softmax_last(scores_sb.T)                # (TB, S)


def _concat_kernel(eh_ref, enc_ref, we_ref, v_ref, out_ref):
    S, TB, H = enc_ref.shape
    e_h = eh_ref[...]                                        # (TB, H), bias pre-folded
    enc2 = enc_ref[...].astype(jnp.float32).reshape(S * TB, H)   # layout no-op (TB % pack == 0)
    e_e = jnp.dot(enc2, we_ref[...], preferred_element_type=jnp.float32)   # (S*TB, H) on MXU
    energy = jnp.tanh(e_e.reshape(S, TB, H) + e_h[None, :, :])
    # v . energy on VPU + lane reduce (skip an M=1 MXU matmul + transpose)
    scores_sb = jnp.sum(energy * v_ref[...][None, :, :], axis=-1)           # (S, TB)
    out_ref[...] = _softmax_last(scores_sb.T)                # (TB, S)


# ----------------------------- tiling policy -------------------------------- #

def _vmem_tier():
    """'big'   -> v4/v5/v6 class: 128 MiB VMEM, single TensorCore.
       'small' -> v7x (64 MiB, 2 TCs) or unknown: conservative defaults.
       'legacy'-> v2/v3: tiny VMEM, leave compiler defaults."""
    try:
        kind = jax.devices()[0].device_kind.lower()
    except Exception:
        return "small"
    if "v2" in kind or "v3" in kind:
        return "legacy"
    if ("v7" not in kind) and ("7x" not in kind) and any(t in kind for t in ("v4", "v5", "v6")):
        return "big"
    return "small"


def _select_tile(B, S, H, itemsize, method, tier):
    """Pick the batch tile TB (multiple of the sublane pack) and a vmem limit.

    VMEM estimate per enc element: double-buffered enc stream (2*itemsize) plus
    f32 intermediates (product / upcast for dot-general; e_e + energy + product
    for concat)."""
    pack = 8 if itemsize >= 4 else (16 if itemsize == 2 else 32)
    if tier == "big":
        base_limit, hard_cap, budget = 100 * _MIB, 110 * _MIB, 88 * _MIB
        prefer_multi_step = False          # single TC: splitting the grid buys nothing
    elif tier == "small":
        base_limit, hard_cap, budget = 48 * _MIB, 56 * _MIB, 40 * _MIB
        prefer_multi_step = True           # 2 TCs: want >=2 (ideally >=4) steps
    else:  # legacy
        base_limit, hard_cap, budget = None, None, 10 * _MIB
        prefer_multi_step = True

    per_elem = 2 * itemsize + (16 if method == "concat" else 8)
    b_cap = max(pack, (B // pack) * pack)  # never let the block exceed the batch
    cands = [tb for tb in (512, 256, 128, 64, 32, 16, 8)
             if tb % pack == 0 and tb <= b_cap and S * tb * H * per_elem <= budget]
    if not cands:
        cands = [pack]

    tb = cands[0]
    if prefer_multi_step:
        for min_steps in (4, 2):
            hit = [t for t in cands if -(-B // t) >= min_steps]
            if hit:
                tb = hit[0]
                break

    vmem_limit = None
    if base_limit is not None:
        est = S * tb * H * per_elem
        vmem_limit = min(hard_cap, max(base_limit, est + 8 * _MIB))
    return tb, pack, vmem_limit


# ----------------------------- wrapper ------------------------------------ #

def attention_forward(method, hidden, encoder_outputs, *, W=None, b=None, v=None):
    """PyTorch-layout inputs: hidden (1, B, H), encoder_outputs (S, B, H).

    Returns attention weights of shape (B, 1, S), matching Attention.forward.
    encoder_outputs is read in its native dtype and native (S, B, H) layout
    (no wrapper transpose / upcast HBM passes)."""
    if method not in ("dot", "general", "concat"):
        raise ValueError(method, "is not an appropriate attention method.")

    S, B, H = encoder_outputs.shape
    f32 = jnp.float32
    enc = encoder_outputs                          # native dtype / layout, streamed by the kernel
    hid = hidden.reshape(B, H).astype(f32)         # tiny; keep the query math in f32

    itemsize = jnp.dtype(enc.dtype).itemsize
    TB, pack, vmem_limit = _select_tile(B, S, H, itemsize, method, _vmem_tier())

    # Degenerate tiny batch only: pad up to one sublane pack (negligible bytes).
    # Ragged large batches use partial last blocks instead of a full-array pad.
    Bp = B
    if B < pack:
        padn = pack - B
        enc = jnp.pad(enc, ((0, 0), (0, padn), (0, 0)))
        hid = jnp.pad(hid, ((0, padn), (0, 0)))
        Bp = pack

    grid = (pl.cdiv(Bp, TB),)
    q_spec = pl.BlockSpec((TB, H), lambda i: (i, 0))
    enc_spec = pl.BlockSpec((S, TB, H), lambda i: (0, i, 0))
    out_spec = pl.BlockSpec((TB, S), lambda i: (i, 0))
    full2d = lambda shape: pl.BlockSpec(shape, lambda i: (0, 0))   # resident params
    out_shape = jax.ShapeDtypeStruct((Bp, S), f32)

    cp_kwargs = dict(dimension_semantics=("parallel",))            # independent batch tiles
    if vmem_limit is not None:
        cp_kwargs["vmem_limit_bytes"] = int(vmem_limit)
    cparams = pltpu.CompilerParams(**cp_kwargs)

    if method in ("dot", "general"):
        # 'general':  hid . (enc @ W.T + b)  ==  enc . (hid @ W)  + const,
        # and the per-row constant hid.b cancels in softmax -> drop it and
        # fold the (B,H)x(H,H) matmul into the wrapper (one tiny XLA op).
        q = hid if method == "dot" else hid @ W.astype(f32)
        out = pl.pallas_call(
            _dot_kernel, out_shape=out_shape, grid=grid,
            in_specs=[q_spec, enc_spec], out_specs=out_spec,
            compiler_params=cparams,
        )(q, enc)
    else:  # concat
        Wf = W.astype(f32)                          # (H, 2H) Linear weight
        e_h = hid @ Wf[:, :H].T + b.astype(f32).reshape(1, H)   # bias folded once, in wrapper
        We_T = Wf[:, H:].T                          # applied to the encoder outputs in-kernel
        out = pl.pallas_call(
            _concat_kernel, out_shape=out_shape, grid=grid,
            in_specs=[q_spec, enc_spec, full2d((H, H)), full2d((1, H))],
            out_specs=out_spec, compiler_params=cparams,
        )(e_h, enc, We_T, v.astype(f32).reshape(1, H))

    return out[:B].reshape(B, 1, S)


# --------------------------- pure-JAX reference ---------------------------- #

def ref_forward(method, hidden, enc, *, W=None, b=None, v=None):
    hidden = hidden.astype(jnp.float32)
    enc = enc.astype(jnp.float32)
    if method == "dot":
        e = jnp.sum(hidden * enc, axis=2)                     # (S, B)
    elif method == "general":
        energy = enc @ W.T + b
        e = jnp.sum(hidden * energy, axis=2)
    elif method == "concat":
        S = enc.shape[0]
        hid_exp = jnp.broadcast_to(hidden, (S,) + hidden.shape[1:])
        energy = jnp.tanh(jnp.concatenate([hid_exp, enc], axis=2) @ W.T + b)
        e = jnp.sum(v * energy, axis=2)
    e = e.T                                                   # (B, S)
    return jax.nn.softmax(e, axis=1)[:, None, :]              # (B, 1, S)


# ------------------------------- main -------------------------------------- #

if __name__ == "__main__":
    B, S, H = 16, 128, 128      # small, TPU-layout friendly
    key = jax.random.PRNGKey(0)
    k_hid, k_enc, k_wg, k_bg, k_wc, k_bc, k_v = jax.random.split(key, 7)

    hidden = jax.random.normal(k_hid, (1, B, H), dtype=jnp.float32)
    encoder_outputs = jax.random.normal(k_enc, (S, B, H), dtype=jnp.float32)

    # Deterministic parameter init (mimics nn.Linear's uniform(-1/sqrt(in), 1/sqrt(in)))
    W_gen = jax.random.uniform(k_wg, (H, H), minval=-1.0 / H**0.5, maxval=1.0 / H**0.5)
    b_gen = jax.random.uniform(k_bg, (H,), minval=-1.0 / H**0.5, maxval=1.0 / H**0.5)
    W_cat = jax.random.uniform(k_wc, (H, 2 * H),
                               minval=-1.0 / (2 * H)**0.5, maxval=1.0 / (2 * H)**0.5)
    b_cat = jax.random.uniform(k_bc, (H,),
                               minval=-1.0 / (2 * H)**0.5, maxval=1.0 / (2 * H)**0.5)
    v_cat = jax.random.normal(k_v, (H,), dtype=jnp.float32)

    cases = {
        "dot": dict(),
        "general": dict(W=W_gen, b=b_gen),
        "concat": dict(W=W_cat, b=b_cat, v=v_cat),
    }

    ok = True
    for method, params in cases.items():
        out = attention_forward(method, hidden, encoder_outputs, **params)
        out = jax.block_until_ready(out)
        ref = ref_forward(method, hidden, encoder_outputs, **params)
        if out.shape != (B, 1, S) or not jnp.allclose(out, ref, atol=1e-4, rtol=1e-4):
            ok = False
            print(f"MISMATCH in method={method} "
                  f"max_abs_err={float(jnp.max(jnp.abs(out - ref)))}")

    if ok:
        print("KERNEL_OK")
</pallas_src>

<mosaic_0001>
module attributes {stable_mosaic.version = 11 : i64} {
  func.func @_dot_kernel(%arg0: i32, %arg1: memref<8x128xf32, #tpu.memory_space<vmem>>, %arg2: memref<128x8x128xf32, #tpu.memory_space<vmem>>, %arg3: memref<8x128xf32, #tpu.memory_space<vmem>>) attributes {dimension_semantics = [#tpu.dimension_semantics<parallel>], iteration_bounds = array<i64: 2>, scalar_prefetch = 0 : i64, scratch_operands = 0 : i64, tpu.core_type = #tpu.core_type<tc>, window_params = [{transform_indices = @transform_0, window_bounds = array<i64: 8, 128>}, {transform_indices = @transform_1, window_bounds = array<i64: 128, 8, 128>}, {transform_indices = @transform_2, window_bounds = array<i64: 8, 128>}]} {
    %c0 = arith.constant 0 : index
    %c0_0 = arith.constant 0 : index
    %0 = vector.load %arg1[%c0, %c0_0] : memref<8x128xf32, #tpu.memory_space<vmem>>, vector<8x128xf32>
    %c0_1 = arith.constant 0 : index
    %c0_2 = arith.constant 0 : index
    %c0_3 = arith.constant 0 : index
    %1 = vector.load %arg2[%c0_1, %c0_2, %c0_3] : memref<128x8x128xf32, #tpu.memory_space<vmem>>, vector<128x8x128xf32>
    %2 = vector.shape_cast %0 : vector<8x128xf32> to vector<1x8x128xf32>
    %3 = vector.broadcast %2 : vector<1x8x128xf32> to vector<128x8x128xf32>
    %4 = arith.mulf %1, %3 : vector<128x8x128xf32>
    %cst = arith.constant dense<0.000000e+00> : vector<128x8xf32>
    %5 = vector.multi_reduction <add>, %4, %cst [2] : vector<128x8x128xf32> to vector<128x8xf32>
    %6 = tpu.transpose %5, [1, 0] : vector<128x8xf32> -> vector<8x128xf32>
    %cst_4 = arith.constant dense<0xFF800000> : vector<8xf32>
    %7 = vector.multi_reduction <maximumf>, %6, %cst_4 [1] : vector<8x128xf32> to vector<8xf32>
    %8 = vector.shape_cast %7 : vector<8xf32> to vector<8x1xf32>
    %9 = vector.broadcast %8 : vector<8x1xf32> to vector<8x128xf32>
    %10 = arith.subf %6, %9 : vector<8x128xf32>
    %11 = math.exp %10 : vector<8x128xf32>
    %cst_5 = arith.constant dense<0.000000e+00> : vector<8xf32>
    %12 = vector.multi_reduction <add>, %11, %cst_5 [1] : vector<8x128xf32> to vector<8xf32>
    %13 = vector.shape_cast %12 : vector<8xf32> to vector<8x1xf32>
    %14 = tpu.reciprocal %13 {approx = true} : vector<8x1xf32> -> vector<8x1xf32>
    %15 = arith.mulf %13, %14 : vector<8x1xf32>
    %cst_6 = arith.constant 2.000000e+00 : f32
    %16 = vector.broadcast %cst_6 : f32 to vector<8x1xf32>
    %17 = arith.subf %16, %15 : vector<8x1xf32>
    %18 = arith.mulf %14, %17 : vector<8x1xf32>
    %19 = vector.broadcast %18 : vector<8x1xf32> to vector<8x128xf32>
    %20 = arith.mulf %11, %19 : vector<8x128xf32>
    %c0_7 = arith.constant 0 : index
    %c0_8 = arith.constant 0 : index
    %21 = vector.load %arg3[%c0_7, %c0_8] : memref<8x128xf32, #tpu.memory_space<vmem>>, vector<8x128xf32>
    tpu.vector_store %arg3[%c0_7, %c0_8], %20 {strides = array<i32>} : memref<8x128xf32, #tpu.memory_space<vmem>>, vector<8x128xf32>,
    return
  }
  func.func @transform_0(%arg0: i32) -> (i32, i32) {
    %c0_i32 = arith.constant 0 : i32
    %c0_i32_0 = arith.constant 0 : i32
    return %arg0, %c0_i32 : i32, i32
  }
  func.func @transform_1(%arg0: i32) -> (i32, i32, i32) {
    %c0_i32 = arith.constant 0 : i32
    %c0_i32_0 = arith.constant 0 : i32
    %c0_i32_1 = arith.constant 0 : i32
    return %c0_i32, %arg0, %c0_i32_0 : i32, i32, i32
  }
  func.func @transform_2(%arg0: i32) -> (i32, i32) {
    %c0_i32 = arith.constant 0 : i32
    %c0_i32_0 = arith.constant 0 : i32
    return %arg0, %c0_i32 : i32, i32
  }
}

</mosaic_0001>

<bundles_post_ra>
// kernel: tpu_custom_call.1
= control target key start
LH: loop header
LB: loop body
LE: loop exit
PB: predicated region body
PF: predicated region fallthrough
CT: control target
= control target key end

     0   :  { %7 = vsyncpa [#allocation3], 0  ;;  %s2680_s0 = inlined_call_operand.hbm [shape: f32[16,128], index: 0, kind: input, shape index: {}]   ;;  %s2681_s1 = inlined_call_operand.hbm [shape: f32[128,16,128], index: 1, kind: input, shape index: {}]   ;;  %s2682_s2 = inlined_call_operand.hbm [shape: f32[16,128], index: 2, kind: output, shape index: {}]  }
   0x1   :  { %9 = vsyncpa [#allocation3 + $0x1], 0 }
   0x2   :  { %10 = vsyncpa [#allocation6], 0 }
   0x3   :  { %12 = vsyncpa [#allocation6 + $0x1], 0 }
   0x4   :  { %13 = vsyncpa [#allocation4], 0 }
   0x5   :  { %15 = vsyncpa [#allocation4 + $0x1], 0  ;;  %s1867_s9 = smov 0   ;;  %s1869_s10 = smov 0  }
   0x6   :  { %s1871_s11 = smov 0   ;;  %s1873_s12 = smov 0  }
   0x7 LB: > { %s1888_s13 = sadd.s32 4294967295, %s1844_s12   ;;  %s1640_s14 = sadd.s32 4294967294, %s1844_s12   ;;  %s1844_s12 = sphi %s1873_s12, %s2698_s12   ;;  %s1840_s11 = sphi %s1871_s11, %s2697_s11   ;;  %s1836_s10 = sphi %s1869_s10, %s2696_s10   ;;  %s1832_s9 = sphi %s1867_s9, %s2695_s9  }
   0x8   : > { %s1892_s15 = sadd.s32 1, %s1844_s12   ;;  %s28_s16 = sadd.s32 1, %s1840_s11 }
   0x9   : > { %s25_s17 = ssub.s32 %s1844_s12, %s1892_s15  ;;  %p35_p0 = scmp.ne.s32.totalorder %s1840_s11, %s1836_s10 }
   0xa   : > { %p26_p1 = scmp.eq.s32.totalorder %s25_s17, 0  ;;  %p36_p2 = scmp.eq.s32.totalorder %s1844_s12, 0 }
   0xb   : > { %p41_p3 = scmp.ne.s32.totalorder %s1836_s10, %s1832_s9  ;;  %p42_p4 = scmp.eq.s32.totalorder %s1888_s13, 0 }
   0xc   : > { %s1904_s18 = scalar_select %p26_p1, %s1840_s11, %s28_s16  }
   0xd   : > { %p1906_p5 = por %p36_p2, %p35_p0  ;;  %p1910_p6 = por %p42_p4, %p41_p3 }
   0xe   : > { %p91_p7 = scmp.eq.s32.totalorder %s1888_s13, 1  ;;  %p97_p8 = scmp.eq.s32.totalorder %s1640_s14, 1 }
   0xf   : > { %s2686_s20 = scalar_select %p1910_p6, 1, 0 }
  0x10   : > { %p1672_p10 = scmp.lt.s32.totalorder %s1844_s12, 2  ;;  %p1917_p11 = por %p91_p7, %p35_p0 }
  0x11   : > { %p1921_p12 = por %p97_p8, %p41_p3  ;;  %s1926_s23 = sand.u32 1, %s1840_s11  }
  0x12   : > { %s2687_s21 = scalar_select %p1917_p11, 1, 0 }
  0x13   : > { %s2688_s22 = scalar_select %p1921_p12, 1, 0 }
  0x14   : > { %s1644_s24 = sshll.u32 %s1844_s12, 7  ;;  %s1643_s25 = sshll.u32 %s1926_s23, 3 }
  0x15   : > { %s1935_s28 = scalar_lea.hbm %s2680_s0, %s1644_s24  ;;  %s121_s29 = scalar_lea.vmem [#allocation2], %s1643_s25 }
  0x16   : > { %s128_s30 = sshll.u32 %s121_s29, 4  ;;  %p1939_p13 = pnand %p1672_p10, %p1906_p5  ;;  %s1943_s30 = int_to_ptr.vmem [resolvable:$true] %s128_s30 }
  0x17   : > { %s1645_s4 = sshll.u32 %s1926_s23, 10  ;;  %s118_s5 = scalar_lea.sflag [#allocation3], %s1926_s23 }
  0x18   : > { %s1714_s6 = scalar_lea.hbm %s1935_s28, 128  ;;  %p1716_p1 = pneg %p1939_p13 }
  0x19   : > { %p1715_p0 = scmp.ne.s32.totalorder %s1935_s28, %s1714_s6  ;;  %s1719_s14 = scalar_lea.hbm %s2680_s0, 256 }
  0x1a   : > { %p1720_p4 = scmp.lt.u32.totalorder %s1935_s28, %s2680_s0  ;;  %p1721_p5 = scmp.lt.u32.totalorder %s1719_s14, %s1714_s6 }
  0x1b   : > { %p1717_p2 = pnand %p1716_p1, %p1715_p0  ;;  %p1723_p8 = scmp.lt.u32.totalorder %s1714_s6, %s1935_s28 }
  0x1c   : > { %p1722_p7 = por %p1721_p5, %p1720_p4 }
  0x1d   : > { %p1718_p3 = pneg %p1717_p2 }
  0x1e   : > { %p1724_p10 = por %p1723_p8, %p1722_p7 }
  0x20   : > { %p1725_p9 = pnand %p1724_p10, %p1718_p3 }
  0x22   : > { %1728 = shalt.err (!%p1725_p9)
}
  0x23   : > { %s1729_s19 = scalar_lea.vmem %s1943_s30, 128  ;;  %s1846_s25 = smov [#allocation2]  }
  0x24   : > { %p1730_p0 = scmp.ne.s32.totalorder %s1943_s30, %s1729_s19  ;;  %s1734_s26 = sshll.u32 %s1846_s25, 4  ;;  %s1735_s26 = int_to_ptr.vmem [resolvable:$false] %s1734_s26 }
  0x25   : > { %s1736_s27 = scalar_lea.vmem %s1735_s26, 256  ;;  %p1737_p11 = scmp.lt.s32.totalorder %s1943_s30, %s1735_s26 }
  0x26   : > { %p1732_p2 = pnand %p1730_p0, %p1716_p1  ;;  %p1738_p4 = scmp.lt.s32.totalorder %s1736_s27, %s1729_s19 }
  0x28   : > { %p1733_p12 = pneg %p1732_p2  ;;  %p1739_p5 = por %p1738_p4, %p1737_p11 }
  0x2a   : > { %p1740_p7 = pnand %p1739_p5, %p1733_p12 }
  0x2c   : > { %1743 = shalt.err (!%p1740_p7)
}
  0x2d   : > { %1664 = dma.hbm_to_vmem [thread:$0]  (!%p1939_p13), %s1935_s28, 128, %s1943_s30, %s118_s5  }
  0x2e   : > { %s1977_s7 = scalar_lea.hbm %s2681_s1, %s1644_s24  ;;  %p1647_p9 = scmp.ge.s32.totalorder %s1844_s12, 1 }
  0x2f   : > { %p153_p11 = scmp.lt.s32.totalorder %s1844_s12, 3  ;;  %s139_s8 = scalar_lea.vmem [#allocation5], %s1645_s4 }
  0x30   : > { %s145_s14 = sshll.u32 %s139_s8, 4  ;;  %s136_s28 = scalar_lea.sflag [#allocation6], %s1926_s23  ;;  %s1987_s14 = int_to_ptr.vmem [resolvable:$true] %s145_s14 }
  0x31   : > { %p1983_p12 = pnand %p1647_p9, %p153_p11  ;;  %s1744_s30 = scalar_lea.hbm %s1977_s7, 16384 }
  0x32   : > { %p1745_p3 = scmp.ne.s32.totalorder %s1977_s7, %s1744_s30  ;;  %s1749_s17 = scalar_lea.hbm %s2681_s1, 32768 }
  0x33   : > { %p1750_p0 = scmp.lt.u32.totalorder %s1977_s7, %s2681_s1  ;;  %p1751_p2 = scmp.lt.u32.totalorder %s1749_s17, %s1744_s30 }
  0x34   : > { %p1747_p8 = pnand %p1745_p3, %p1716_p1  ;;  %p1753_p5 = scmp.lt.u32.totalorder %s1744_s30, %s1977_s7 }
  0x35   : > { %p1752_p4 = por %p1751_p2, %p1750_p0 }
  0x36   : > { %p1748_p10 = pneg %p1747_p8 }
  0x37   : > { %p1754_p7 = por %p1753_p5, %p1752_p4 }
  0x39   : > { %p1755_p9 = pnand %p1754_p7, %p1748_p10 }
  0x3b   : > { %1758 = shalt.err (!%p1755_p9)
}
  0x3c   : > { %s1759_s25 = scalar_lea.vmem %s1987_s14, 16384  ;;  %s1847_s26 = smov [#allocation5]  }
  0x3d   : > { %p1760_p11 = scmp.ne.s32.totalorder %s1987_s14, %s1759_s25  ;;  %s1764_s27 = sshll.u32 %s1847_s26, 4  ;;  %s1765_s27 = int_to_ptr.vmem [resolvable:$false] %s1764_s27 }
  0x3e   : > { %s1766_s29 = scalar_lea.vmem %s1765_s27, 32768  ;;  %p1767_p6 = scmp.lt.s32.totalorder %s1987_s14, %s1765_s27 }
  0x3f   : > { %p1762_p3 = pnand %p1760_p11, %p1716_p1  ;;  %p1768_p0 = scmp.lt.s32.totalorder %s1766_s29, %s1759_s25 }
  0x41   : > { %p1763_p8 = pneg %p1762_p3  ;;  %p1769_p2 = por %p1768_p0, %p1767_p6 }
  0x43   : > { %p1770_p4 = pnand %p1769_p2, %p1763_p8 }
  0x45   : > { %1773 = shalt.err (!%p1770_p4)
}
  0x46   : > { %s1848_s6 = smov 256   ;;  %s1849_s8 = smov 128  }
  0x47   : > { %s1850_s30 = smov 8   ;;  %157 = sbr.rel (%p1983_p12) target bundleno = 884 (0x374), region = 28 }
  0x48   : > { %1667 = dma.hbm_to_vmem [thread:$0]  (!%p1939_p13), %s1977_s7, 16384, %s1987_s14, %s136_s28, %s1848_s6, %s1849_s8, %s1850_s30  }
  0x49   : > { %s2018_s24 = sand.u32 (!%p1983_p12), 1, %s1836_s10   ;;  %p2691_p6 = scmp.ne.s32.totalorder (!%p1983_p12), %s2686_s20, 0 }
  0x4a   : > { %s1648_s5 = sshll.u32 (!%p1983_p12), %s2018_s24, 3  ;;  %s160_s17 = scalar_lea.sflag (!%p1983_p12), [#allocation3], %s2018_s24 }
  0x4b   : > { %s2024_s19 = scalar_lea.vmem (!%p1983_p12), [#allocation2], %s1648_s5 }
  0x4e   : > { %1819 = dma.done.wait (%p2691_p6), %s160_s17, 128  }
  0x4f   : > { %1821 = vsyncadd (%p2691_p6), %s160_s17, 4294967168  ;;  %s1649_s23 = sshll.u32 %s2018_s24, 10  ;;  %s169_s3 = scalar_lea.sflag [#allocation6], %s2018_s24 }
  0x50   : > { %s2032_s7 = scalar_lea.vmem [#allocation5], %s1649_s23 }
  0x51   : > { %1823 = dma.done.wait (%p2691_p6), %s169_s3, 16384  }
  0x52   : > { %1825 = vsyncadd (%p2691_p6), %s169_s3, 4294950912  ;;  %v2039_v0 = vld [vmem:[%s2024_s19] sm:$0xff]  ;;  %v199_v2 = vld [vmem:[%s2032_s7] sm:$0xff]  ;;  %vm1353_vm0 = vcmask 1041409   ;;  %vm1355_vm1 = vcmask 1042434   ;;  %vm1357_vm2 = vcmask 1043459  }
  0x53   : > { %v201_v1 = vld [vmem:[%s2032_s7 + $0x10] sm:$0xff]  ;;  %v327_v4 = vmul.f32 %v199_v2, %v2039_v0  ;;  %v202_v5 = vld [vmem:[%s2032_s7 + $0x18] sm:$0xff]  ;;  %v200_v6 = vld [vmem:[%s2032_s7 + $0x8] sm:$0xff]  ;;  %vm1359_vm3 = vcmask 1044484   ;;  %vm1361_vm4 = vcmask 1045509   ;;  %vm1363_vm5 = vcmask 1046534  }
  0x54   : > { %v329_v3 = vmul.f32 %v201_v1, %v2039_v0  ;;  %v330_v7 = vmul.f32 %v202_v5, %v2039_v0  ;;  %v328_v8 = vmul.f32 %v200_v6, %v2039_v0  ;;  %v204_v9 = vld [vmem:[%s2032_s7 + $0x28] sm:$0xff]  ;;  %v203_v10 = vld [vmem:[%s2032_s7 + $0x20] sm:$0xff]  ;;  %v210_v17 = vld [vmem:[%s2032_s7 + $0x58] sm:$0xff]  ;;  %vm1365_vm6 = vcmask 1047559   ;;  %s1652_s20 = sshll.u32 %s1888_s13, 7  ;;  %s197_s14 = scalar_lea.vmem [#allocation7], %s1648_s5 }
  0x55   : > { %455 = vadd.xlane.f32.xlu0 %v327_v4  ;;  %v332_v11 = vmul.f32 %v204_v9, %v2039_v0  ;;  %v331_v12 = vmul.f32 %v203_v10, %v2039_v0  ;;  %v208_v13 = vld [vmem:[%s2032_s7 + $0x48] sm:$0xff]  ;;  %v207_v14 = vld [vmem:[%s2032_s7 + $0x40] sm:$0xff]  ;;  %v209_v18 = vld [vmem:[%s2032_s7 + $0x50] sm:$0xff]  ;;  %v338_v19 = vmul.f32 %v210_v17, %v2039_v0  ;;  %s1547_s16 = sshll.u32 %s197_s14, 4  ;;  %s2636_s25 = scalar_lea.hbm %s2682_s2, %s1652_s20  ;;  %s2638_s16 = int_to_ptr.vmem [resolvable:$true] %s1547_s16 }
  0x56   : > { %459 = vadd.xlane.f32.xlu1 %v329_v3  ;;  %v336_v15 = vmul.f32 %v208_v13, %v2039_v0  ;;  %v335_v16 = vmul.f32 %v207_v14, %v2039_v0  ;;  %v337_v20 = vmul.f32 %v209_v18, %v2039_v0  ;;  %v216_v21 = vld [vmem:[%s2032_s7 + $0x88] sm:$0xff]  ;;  %v215_v22 = vld [vmem:[%s2032_s7 + $0x80] sm:$0xff]  ;;  %v205_v26 = vld [vmem:[%s2032_s7 + $0x30] sm:$0xff]  ;;  %s1534_s26 = scalar_lea.sflag [#allocation4], %s2018_s24  ;;  %s1774_s27 = scalar_lea.vmem %s2638_s16, 128 }
  0x57   : > { %v344_v23 = vmul.f32 %v216_v21, %v2039_v0  ;;  %v343_v24 = vmul.f32 %v215_v22, %v2039_v0  ;;  %v211_v25 = vld [vmem:[%s2032_s7 + $0x60] sm:$0xff]  ;;  %v333_v28 = vmul.f32 %v205_v26, %v2039_v0  ;;  %v206_v29 = vld [vmem:[%s2032_s7 + $0x38] sm:$0xff]  ;;  %v217_v30 = vld [vmem:[%s2032_s7 + $0x90] sm:$0xff]  ;;  %p1775_p13 = scmp.ne.s32.totalorder %s2638_s16, %s1774_s27  ;;  %p2692_p1 = scmp.ne.s32.totalorder %s2687_s21, 0 }
  0x58   : > { %v339_v27 = vmul.f32 %v211_v25, %v2039_v0  ;;  %v334_v31 = vmul.f32 %v206_v29, %v2039_v0  ;;  %v345_v32 = vmul.f32 %v217_v30, %v2039_v0  ;;  %v218_v33 = vld [vmem:[%s2032_s7 + $0x98] sm:$0xff]  ;;  %v212_v34 = vld [vmem:[%s2032_s7 + $0x68] sm:$0xff]  ;;  %v223_v38 = vld [vmem:[%s2032_s7 + $0xc0] sm:$0xff]  ;;  %s1851_s13 = smov [#allocation7]  }
  0x59   : > { %457 = vadd.xlane.f32.xlu0 %v328_v8  ;;  %v346_v35 = vmul.f32 %v218_v33, %v2039_v0  ;;  %v340_v36 = vmul.f32 %v212_v34, %v2039_v0  ;;  %v224_v37 = vld [vmem:[%s2032_s7 + $0xc8] sm:$0xff]  ;;  %v351_v40 = vmul.f32 %v223_v38, %v2039_v0  ;;  %v219_v41 = vld [vmem:[%s2032_s7 + $0xa0] sm:$0xff]  ;;  %v213_v42 = vld [vmem:[%s2032_s7 + $0x70] sm:$0xff]  ;;  %p1776_p12 = pnand %p1775_p13, %p2692_p1  ;;  %s1778_s29 = sshll.u32 %s1851_s13, 4  ;;  %s1779_s29 = int_to_ptr.vmem [resolvable:$false] %s1778_s29 }
  0x5a   : > { %461 = vadd.xlane.f32.xlu1 %v330_v7  ;;  %v352_v39 = vmul.f32 %v224_v37, %v2039_v0  ;;  %v347_v43 = vmul.f32 %v219_v41, %v2039_v0  ;;  %v341_v44 = vmul.f32 %v213_v42, %v2039_v0  ;;  %v214_v45 = vld [vmem:[%s2032_s7 + $0x78] sm:$0xff]  ;;  %v225_v46 = vld [vmem:[%s2032_s7 + $0xd0] sm:$0xff]  ;;  %v220_v50 = vld [vmem:[%s2032_s7 + $0xa8] sm:$0xff]  ;;  %s1780_s6 = scalar_lea.vmem %s1779_s29, 256  ;;  %p1781_p5 = scmp.lt.s32.totalorder %s2638_s16, %s1779_s29 }
  0x5b   : > { %v342_v47 = vmul.f32 %v214_v45, %v2039_v0  ;;  %v353_v48 = vmul.f32 %v225_v46, %v2039_v0  ;;  %v226_v49 = vld [vmem:[%s2032_s7 + $0xd8] sm:$0xff]  ;;  %v348_v52 = vmul.f32 %v220_v50, %v2039_v0  ;;  %v232_v53 = vld [vmem:[%s2032_s7 + $0x108] sm:$0xff]  ;;  %v231_v54 = vld [vmem:[%s2032_s7 + $0x100] sm:$0xff]  ;;  %p1777_p10 = pneg %p1776_p12  ;;  %p1782_p7 = scmp.lt.s32.totalorder %s1780_s6, %s1774_s27 }
  0x5c   : > { %v354_v51 = vmul.f32 %v226_v49, %v2039_v0  ;;  %v360_v55 = vmul.f32 %v232_v53, %v2039_v0  ;;  %v359_v56 = vmul.f32 %v231_v54, %v2039_v0  ;;  %v227_v57 = vld [vmem:[%s2032_s7 + $0xe0] sm:$0xff]  ;;  %v221_v58 = vld [vmem:[%s2032_s7 + $0xb0] sm:$0xff]  ;;  %v222_v61 = vld [vmem:[%s2032_s7 + $0xb8] sm:$0xff] }
  0x5d   : > { %463 = vadd.xlane.f32.xlu0 %v331_v12  ;;  %v355_v59 = vmul.f32 %v227_v57, %v2039_v0  ;;  %v349_v60 = vmul.f32 %v221_v58, %v2039_v0  ;;  %v233_v62 = vld [vmem:[%s2032_s7 + $0x110] sm:$0xff]  ;;  %v350_v63 = vmul.f32 %v222_v61, %v2039_v0  ;;  %v234_v2 = vld [vmem:[%s2032_s7 + $0x118] sm:$0xff]  ;;  %v228_v3 = vld [vmem:[%s2032_s7 + $0xe8] sm:$0xff]  ;;  %p1783_p9 = por %p1782_p7, %p1781_p5 }
  0x5e   : > { %465 = vadd.xlane.f32.xlu1 %v332_v11  ;;  %v361_v1 = vmul.f32 %v233_v62, %v2039_v0  ;;  %v362_v4 = vmul.f32 %v234_v2, %v2039_v0  ;;  %v356_v5 = vmul.f32 %v228_v3, %v2039_v0  ;;  %v240_v6 = vld [vmem:[%s2032_s7 + $0x148] sm:$0xff]  ;;  %v239_v7 = vld [vmem:[%s2032_s7 + $0x140] sm:$0xff]  ;;  %v229_v11 = vld [vmem:[%s2032_s7 + $0xf0] sm:$0xff] }
  0x5f   : > { %v368_v8 = vmul.f32 %v240_v6, %v2039_v0  ;;  %v367_v9 = vmul.f32 %v239_v7, %v2039_v0  ;;  %v235_v10 = vld [vmem:[%s2032_s7 + $0x120] sm:$0xff]  ;;  %v357_v13 = vmul.f32 %v229_v11, %v2039_v0  ;;  %v230_v14 = vld [vmem:[%s2032_s7 + $0xf8] sm:$0xff]  ;;  %v248_v22 = vld [vmem:[%s2032_s7 + $0x188] sm:$0xff]  ;;  %p1784_p11 = pnand %p1783_p9, %p1777_p10 }
  0x60   : > { %v363_v12 = vmul.f32 %v235_v10, %v2039_v0  ;;  %v242_v18 = vld [vmem:[%s2032_s7 + $0x158] sm:$0xff]  ;;  %v243_v26 = vld [vmem:[%s2032_s7 + $0x160] sm:$0xff]  ;;  %v256_v38 = vld [vmem:[%s2032_s7 + $0x1c8] sm:$0xff] }
  0x61   : > { %471 = vadd.xlane.f32.xlu0 %v335_v16  ;;  %v358_v16 = vmul.f32 %v230_v14, %v2039_v0  ;;  %v238_v30 = vld [vmem:[%s2032_s7 + $0x138] sm:$0xff]  ;;  %v251_v42 = vld [vmem:[%s2032_s7 + $0x1a0] sm:$0xff]  ;;  %v264_v54 = vld [vmem:[%s2032_s7 + $0x208] sm:$0xff] }
  0x62   : > { %473 = vadd.xlane.f32.xlu1 %v336_v15  ;;  %v241_v15 = vld [vmem:[%s2032_s7 + $0x150] sm:$0xff]  ;;  %v250_v34 = vld [vmem:[%s2032_s7 + $0x198] sm:$0xff]  ;;  %v259_v58 = vld [vmem:[%s2032_s7 + $0x1e0] sm:$0xff] }
  0x63   : > { %v369_v17 = vmul.f32 %v241_v15, %v2039_v0  ;;  %v246_v46 = vld [vmem:[%s2032_s7 + $0x178] sm:$0xff]  ;;  %v272_v7 = vld [vmem:[%s2032_s7 + $0x248] sm:$0xff]  ;;  %v267_v11 = vld [vmem:[%s2032_s7 + $0x220] sm:$0xff] }
  0x64   : > { %v258_v50 = vld [vmem:[%s2032_s7 + $0x1d8] sm:$0xff] }
  0x65   : > { %475 = vadd.xlane.f32.xlu0 %v337_v20  ;;  %v370_v20 = vmul.f32 %v242_v18, %v2039_v0  ;;  %v254_v62 = vld [vmem:[%s2032_s7 + $0x1b8] sm:$0xff] }
  0x66   : > { %477 = vadd.xlane.f32.xlu1 %v338_v19  ;;  %v236_v19 = vld [vmem:[%s2032_s7 + $0x128] sm:$0xff]  ;;  %v266_v3 = vld [vmem:[%s2032_s7 + $0x218] sm:$0xff] }
  0x67   : > { %v364_v21 = vmul.f32 %v236_v19, %v2039_v0  ;;  %v262_v15 = vld [vmem:[%s2032_s7 + $0x1f8] sm:$0xff] }
  0x68   : > { %v390_v18 = vmul.f32 %v262_v15, %v2039_v0  ;;  %v277_v15 = vld [vmem:[%s2032_s7 + $0x270] sm:$0xff] }
  0x69   : > { %487 = vadd.xlane.f32.xlu0 %v343_v24  ;;  %v376_v24 = vmul.f32 %v248_v22, %v2039_v0 }
  0x6a   : > { %489 = vadd.xlane.f32.xlu1 %v344_v23  ;;  %v247_v23 = vld [vmem:[%s2032_s7 + $0x180] sm:$0xff] }
  0x6b   : > { %v375_v25 = vmul.f32 %v247_v23, %v2039_v0 }
  0x6d   : > { %467 = vadd.xlane.f32.xlu0 %v333_v28  ;;  %v371_v28 = vmul.f32 %v243_v26, %v2039_v0 }
  0x6e   : > { %479 = vadd.xlane.f32.xlu1 %v339_v27  ;;  %v237_v27 = vld [vmem:[%s2032_s7 + $0x130] sm:$0xff] }
  0x6f   : > { %v365_v29 = vmul.f32 %v237_v27, %v2039_v0 }
  0x71   : > { %491 = vadd.xlane.f32.xlu0 %v345_v32  ;;  %v366_v32 = vmul.f32 %v238_v30, %v2039_v0 }
  0x72   : > { %469 = vadd.xlane.f32.xlu1 %v334_v31  ;;  %v249_v31 = vld [vmem:[%s2032_s7 + $0x190] sm:$0xff] }
  0x73   : > { %v377_v33 = vmul.f32 %v249_v31, %v2039_v0 }
  0x75   : > { %481 = vadd.xlane.f32.xlu0 %v340_v36  ;;  %v378_v36 = vmul.f32 %v250_v34, %v2039_v0 }
  0x76   : > { %493 = vadd.xlane.f32.xlu1 %v346_v35  ;;  %v244_v35 = vld [vmem:[%s2032_s7 + $0x168] sm:$0xff] }
  0x77   : > { %v372_v37 = vmul.f32 %v244_v35, %v2039_v0  ;;  %v275_v35 = vld [vmem:[%s2032_s7 + $0x260] sm:$0xff] }
  0x79   : > { %503 = vadd.xlane.f32.xlu0 %v351_v40  ;;  %v384_v40 = vmul.f32 %v256_v38, %v2039_v0 }
  0x7a   : > { %505 = vadd.xlane.f32.xlu1 %v352_v39  ;;  %v255_v39 = vld [vmem:[%s2032_s7 + $0x1c0] sm:$0xff] }
  0x7b   : > { %v383_v41 = vmul.f32 %v255_v39, %v2039_v0 }
  0x7d   : > { %483 = vadd.xlane.f32.xlu0 %v341_v44  ;;  %v379_v44 = vmul.f32 %v251_v42, %v2039_v0  ;;  %v403_v42 = vmul.f32 %v275_v35, %v2039_v0  ;;  %v284_v35 = vld [vmem:[%s2032_s7 + $0x2a8] sm:$0xff] }
  0x7e   : > { %495 = vadd.xlane.f32.xlu1 %v347_v43  ;;  %v245_v43 = vld [vmem:[%s2032_s7 + $0x170] sm:$0xff] }
  0x7f   : > { %v373_v45 = vmul.f32 %v245_v43, %v2039_v0 }
  0x81   : > { %507 = vadd.xlane.f32.xlu0 %v353_v48  ;;  %v374_v48 = vmul.f32 %v246_v46, %v2039_v0 }
  0x82   : > { %485 = vadd.xlane.f32.xlu1 %v342_v47  ;;  %v257_v47 = vld [vmem:[%s2032_s7 + $0x1d0] sm:$0xff] }
  0x83   : > { %v385_v49 = vmul.f32 %v257_v47, %v2039_v0  ;;  %v270_v47 = vld [vmem:[%s2032_s7 + $0x238] sm:$0xff] }
  0x85   : > { %497 = vadd.xlane.f32.xlu0 %v348_v52  ;;  %v386_v52 = vmul.f32 %v258_v50, %v2039_v0 }
  0x86   : > { %509 = vadd.xlane.f32.xlu1 %v354_v51  ;;  %v252_v51 = vld [vmem:[%s2032_s7 + $0x1a8] sm:$0xff] }
  0x87   : > { %v380_v53 = vmul.f32 %v252_v51, %v2039_v0 }
  0x89   : > { %519 = vadd.xlane.f32.xlu0 %v359_v56  ;;  %v392_v56 = vmul.f32 %v264_v54, %v2039_v0 }
  0x8a   : > { %521 = vadd.xlane.f32.xlu1 %v360_v55  ;;  %v263_v55 = vld [vmem:[%s2032_s7 + $0x200] sm:$0xff] }
  0x8b   : > { %v391_v57 = vmul.f32 %v263_v55, %v2039_v0 }
  0x8d   : > { %499 = vadd.xlane.f32.xlu0 %v349_v60  ;;  %v387_v60 = vmul.f32 %v259_v58, %v2039_v0  ;;  %v276_v58 = vld [vmem:[%s2032_s7 + $0x268] sm:$0xff] }
  0x8e   : > { %511 = vadd.xlane.f32.xlu1 %v355_v59  ;;  %v253_v59 = vld [vmem:[%s2032_s7 + $0x1b0] sm:$0xff] }
  0x8f   : > { %v381_v61 = vmul.f32 %v253_v59, %v2039_v0 }
  0x91   : > { %523 = vadd.xlane.f32.xlu0 %v361_v1  ;;  %v382_v1 = vmul.f32 %v254_v62, %v2039_v0 }
  0x92   : > { %501 = vadd.xlane.f32.xlu1 %v350_v63  ;;  %v265_v63 = vld [vmem:[%s2032_s7 + $0x210] sm:$0xff] }
  0x93   : > { %v393_v2 = vmul.f32 %v265_v63, %v2039_v0 }
  0x95   : > { %513 = vadd.xlane.f32.xlu0 %v356_v5  ;;  %v394_v5 = vmul.f32 %v266_v3, %v2039_v0 }
  0x96   : > { %525 = vadd.xlane.f32.xlu1 %v362_v4  ;;  %v260_v4 = vld [vmem:[%s2032_s7 + $0x1e8] sm:$0xff] }
  0x97   : > { %v388_v6 = vmul.f32 %v260_v4, %v2039_v0  ;;  %v288_v4 = vld [vmem:[%s2032_s7 + $0x2c8] sm:$0xff] }
  0x99   : > { %535 = vadd.xlane.f32.xlu0 %v367_v9  ;;  %v400_v9 = vmul.f32 %v272_v7, %v2039_v0 }
  0x9a   : > { %537 = vadd.xlane.f32.xlu1 %v368_v8  ;;  %v271_v8 = vld [vmem:[%s2032_s7 + $0x240] sm:$0xff] }
  0x9b   : > { %v399_v10 = vmul.f32 %v271_v8, %v2039_v0 }
  0x9d   : > { %515 = vadd.xlane.f32.xlu0 %v357_v13  ;;  %v395_v13 = vmul.f32 %v267_v11, %v2039_v0 }
  0x9e   : > { %527 = vadd.xlane.f32.xlu1 %v363_v12  ;;  %v261_v12 = vld [vmem:[%s2032_s7 + $0x1f0] sm:$0xff] }
  0x9f   : > { %v389_v14 = vmul.f32 %v261_v12, %v2039_v0 }
  0xa1   : > { %539 = vadd.xlane.f32.xlu0 %v369_v17  ;;  %v839_v17 = vlaneseq }
  0xa2   : > { %517 = vadd.xlane.f32.xlu1 %v358_v16  ;;  %v273_v16 = vld [vmem:[%s2032_s7 + $0x250] sm:$0xff] }
  0xa3   : > { %v401_v19 = vmul.f32 %v273_v16, %v2039_v0  ;;  %v840_v22 = vand.u32 127, %v839_v17  ;;  %v842_v23 = vshrl.u32 %v839_v17, 7 }
  0xa5   : > { %529 = vadd.xlane.f32.xlu0 %v364_v21  ;;  %v268_v21 = vld [vmem:[%s2032_s7 + $0x228] sm:$0xff]  ;;  %v2191_v30 = vsub.s32 %v840_v22, %v842_v23 }
  0xa6   : > { %541 = vadd.xlane.f32.xlu1 %v370_v20  ;;  %v274_v20 = vld [vmem:[%s2032_s7 + $0x258] sm:$0xff] }
  0xa9   : > { %551 = vadd.xlane.f32.xlu0 %v375_v25  ;;  %v396_v25 = vmul.f32 %v268_v21, %v2039_v0  ;;  %v278_v21 = vld [vmem:[%s2032_s7 + $0x278] sm:$0xff] }
  0xaa   : > { %553 = vadd.xlane.f32.xlu1 %v376_v24  ;;  %v402_v24 = vmul.f32 %v274_v20, %v2039_v0  ;;  %v405_v20 = vmul.f32 %v277_v15, %v2039_v0 }
  0xad   : > { %531 = vadd.xlane.f32.xlu0 %v365_v29  ;;  %v279_v29 = vld [vmem:[%s2032_s7 + $0x280] sm:$0xff] }
  0xae   : > { %543 = vadd.xlane.f32.xlu1 %v371_v28  ;;  %v280_v28 = vld [vmem:[%s2032_s7 + $0x288] sm:$0xff] }
  0xaf   : > { %v408_v31 = vmul.f32 %v280_v28, %v2039_v0 }
  0xb1   : > { %555 = vadd.xlane.f32.xlu0 %v377_v33 }
  0xb2   : > { %533 = vadd.xlane.f32.xlu1 %v366_v32  ;;  %v407_v32 = vmul.f32 %v279_v29, %v2039_v0 }
  0xb5   : > { %545 = vadd.xlane.f32.xlu0 %v372_v37 }
  0xb6   : > { %557 = vadd.xlane.f32.xlu1 %v378_v36  ;;  %v269_v36 = vld [vmem:[%s2032_s7 + $0x230] sm:$0xff] }
  0xb7   : > { %v397_v43 = vmul.f32 %v269_v36, %v2039_v0 }
  0xb9   : > { %567 = vadd.xlane.f32.xlu0 %v383_v41 }
  0xba   : > { %569 = vadd.xlane.f32.xlu1 %v384_v40 }
  0xbd   : > { %547 = vadd.xlane.f32.xlu0 %v373_v45 }
  0xbe   : > { %559 = vadd.xlane.f32.xlu1 %v379_v44 }
  0xc1   : > { %571 = vadd.xlane.f32.xlu0 %v385_v49 }
  0xc2   : > { %549 = vadd.xlane.f32.xlu1 %v374_v48  ;;  %v281_v48 = vld [vmem:[%s2032_s7 + $0x290] sm:$0xff] }
  0xc3   : > { %v409_v54 = vmul.f32 %v281_v48, %v2039_v0 }
  0xc5   : > { %561 = vadd.xlane.f32.xlu0 %v380_v53  ;;  %v398_v53 = vmul.f32 %v270_v47, %v2039_v0 }
  0xc6   : > { %573 = vadd.xlane.f32.xlu1 %v386_v52 }
  0xc9   : > { %583 = vadd.xlane.f32.xlu0 %v391_v57  ;;  %v282_v57 = vld [vmem:[%s2032_s7 + $0x298] sm:$0xff] }
  0xca   : > { %585 = vadd.xlane.f32.xlu1 %v392_v56  ;;  %v410_v63 = vmul.f32 %v282_v57, %v2039_v0 }
  0xcd   : > { %563 = vadd.xlane.f32.xlu0 %v381_v61 }
  0xce   : > { %575 = vadd.xlane.f32.xlu1 %v387_v60 }
  0xd1   : > { %587 = vadd.xlane.f32.xlu0 %v393_v2 }
  0xd2   : > { %565 = vadd.xlane.f32.xlu1 %v382_v1  ;;  %v404_v1 = vmul.f32 %v276_v58, %v2039_v0 }
  0xd5   : > { %577 = vadd.xlane.f32.xlu0 %v388_v6 }
  0xd6   : > { %589 = vadd.xlane.f32.xlu1 %v394_v5  ;;  %v287_v5 = vld [vmem:[%s2032_s7 + $0x2c0] sm:$0xff] }
  0xd9   : > { %599 = vadd.xlane.f32.xlu0 %v399_v10  ;;  %v415_v10 = vmul.f32 %v287_v5, %v2039_v0 }
  0xda   : > { %601 = vadd.xlane.f32.xlu1 %v400_v9  ;;  %v416_v9 = vmul.f32 %v288_v4, %v2039_v0 }
  0xdd   : > { %579 = vadd.xlane.f32.xlu0 %v389_v14  ;;  %v283_v14 = vld [vmem:[%s2032_s7 + $0x2a0] sm:$0xff] }
  0xde   : > { %591 = vadd.xlane.f32.xlu1 %v395_v13 }
  0xe1   : > { %603 = vadd.xlane.f32.xlu0 %v401_v19  ;;  %v411_v19 = vmul.f32 %v283_v14, %v2039_v0 }
  0xe2   : > { %581 = vadd.xlane.f32.xlu1 %v390_v18  ;;  %v456_v27 = vpop.xlane.xlu0 %455 }
  0xe3   : > { %v460_v26 = vpop.xlane.xlu1 %459  ;;  %v844_v37 = vrot.slane %v456_v27, %v2191_v30  ;;  %v406_v27 = vmul.f32 %v278_v21, %v2039_v0  ;;  %v303_v21 = vld [vmem:[%s2032_s7 + $0x340] sm:$0xff] }
  0xe4   : > { %v852_v40 = vrot.slane %v460_v26, %v2191_v30 }
  0xe5   : > { %593 = vadd.xlane.f32.xlu0 %v396_v25 }
  0xe6   : > { %605 = vadd.xlane.f32.xlu1 %v402_v24  ;;  %v458_v34 = vpop.xlane.xlu0 %457  ;;  %v289_v24 = vld [vmem:[%s2032_s7 + $0x2d0] sm:$0xff] }
  0xe7   : > { %v462_v33 = vpop.xlane.xlu1 %461  ;;  %v848_v39 = vrot.slane %v458_v34, %v2191_v30  ;;  %v417_v29 = vmul.f32 %v289_v24, %v2039_v0 }
  0xe8   : > { %v856_v38 = vrot.slane %v462_v33, %v2191_v30 }
  0xe9   : > { %v1354_v41 = vsel %vm1353_vm0, %v848_v39, %v844_v37  ;;  %615 = vadd.xlane.f32.xlu0 %v407_v32 }
  0xea   : > { %617 = vadd.xlane.f32.xlu1 %v408_v31  ;;  %v1356_v44 = vsel %vm1355_vm1, %v852_v40, %v1354_v41  ;;  %v464_v46 = vpop.xlane.xlu0 %463  ;;  %v290_v31 = vld [vmem:[%s2032_s7 + $0x2d8] sm:$0xff]  ;;  %v412_v40 = vmul.f32 %v284_v35, %v2039_v0  ;;  %v296_v41 = vld [vmem:[%s2032_s7 + $0x308] sm:$0xff] }
  0xeb   : > { %v466_v45 = vpop.xlane.xlu1 %465  ;;  %v1358_v50 = vsel %vm1357_vm2, %v856_v38, %v1356_v44  ;;  %v860_v51 = vrot.slane %v464_v46, %v2191_v30  ;;  %v418_v38 = vmul.f32 %v290_v31, %v2039_v0  ;;  %v424_v48 = vmul.f32 %v296_v41, %v2039_v0  ;;  %v299_v31 = vld [vmem:[%s2032_s7 + $0x320] sm:$0xff]  ;;  %v305_v41 = vld [vmem:[%s2032_s7 + $0x350] sm:$0xff] }
  0xec   : > { %v864_v49 = vrot.slane %v466_v45, %v2191_v30  ;;  %v295_v45 = vld [vmem:[%s2032_s7 + $0x300] sm:$0xff] }
  0xed   : > { %v1360_v52 = vsel %vm1359_vm3, %v860_v51, %v1358_v50  ;;  %595 = vadd.xlane.f32.xlu0 %v397_v43  ;;  %v423_v50 = vmul.f32 %v295_v45, %v2039_v0 }
  0xee   : > { %607 = vadd.xlane.f32.xlu1 %v403_v42  ;;  %v472_v56 = vpop.xlane.xlu0 %471  ;;  %v1362_v59 = vsel %vm1361_vm4, %v864_v49, %v1360_v52 }
  0xef   : > { %v474_v55 = vpop.xlane.xlu1 %473  ;;  %v876_v61 = vrot.slane %v472_v56, %v2191_v30 }
  0xf0   : > { %v880_v60 = vrot.slane %v474_v55, %v2191_v30  ;;  %v285_v55 = vld [vmem:[%s2032_s7 + $0x2b0] sm:$0xff] }
  0xf1   : > { %619 = vadd.xlane.f32.xlu0 %v409_v54  ;;  %v291_v54 = vld [vmem:[%s2032_s7 + $0x2e0] sm:$0xff] }
  0xf2   : > { %v1367_v62 = vsel %vm1353_vm0, %v880_v60, %v876_v61  ;;  %597 = vadd.xlane.f32.xlu1 %v398_v53  ;;  %v476_v3 = vpop.xlane.xlu0 %475  ;;  %v413_v60 = vmul.f32 %v285_v55, %v2039_v0  ;;  %v286_v61 = vld [vmem:[%s2032_s7 + $0x2b8] sm:$0xff] }
  0xf3   : > { %v478_v2 = vpop.xlane.xlu1 %477  ;;  %v884_v7 = vrot.slane %v476_v3, %v2191_v30  ;;  %v414_v4 = vmul.f32 %v286_v61, %v2039_v0 }
  0xf4   : > { %v888_v6 = vrot.slane %v478_v2, %v2191_v30 }
  0xf5   : > { %v1368_v8 = vsel %vm1355_vm1, %v884_v7, %v1367_v62  ;;  %609 = vadd.xlane.f32.xlu0 %v404_v1  ;;  %v297_v1 = vld [vmem:[%s2032_s7 + $0x310] sm:$0xff]  ;;  %v298_v7 = vld [vmem:[%s2032_s7 + $0x318] sm:$0xff] }
  0xf6   : > { %621 = vadd.xlane.f32.xlu1 %v410_v63  ;;  %v488_v12 = vpop.xlane.xlu0 %487  ;;  %v1369_v13 = vsel %vm1357_vm2, %v888_v6, %v1368_v8  ;;  %v425_v6 = vmul.f32 %v297_v1, %v2039_v0  ;;  %v426_v14 = vmul.f32 %v298_v7, %v2039_v0 }
  0xf7   : > { %v490_v11 = vpop.xlane.xlu1 %489  ;;  %v908_v17 = vrot.slane %v488_v12, %v2191_v30 }
  0xf8   : > { %v912_v16 = vrot.slane %v490_v11, %v2191_v30  ;;  %v292_v11 = vld [vmem:[%s2032_s7 + $0x2e8] sm:$0xff] }
  0xf9   : > { %631 = vadd.xlane.f32.xlu0 %v415_v10 }
  0xfa   : > { %v1374_v18 = vsel %vm1353_vm0, %v912_v16, %v908_v17  ;;  %633 = vadd.xlane.f32.xlu1 %v416_v9  ;;  %v468_v23 = vpop.xlane.xlu0 %467  ;;  %v420_v16 = vmul.f32 %v292_v11, %v2039_v0  ;;  %v304_v17 = vld [vmem:[%s2032_s7 + $0x348] sm:$0xff]  ;;  %v302_v11 = vld [vmem:[%s2032_s7 + $0x338] sm:$0xff] }
  0xfb   : > { %v480_v22 = vpop.xlane.xlu1 %479  ;;  %v868_v26 = vrot.slane %v468_v23, %v2191_v30  ;;  %v432_v24 = vmul.f32 %v304_v17, %v2039_v0 }
  0xfc   : > { %v892_v25 = vrot.slane %v480_v22, %v2191_v30 }
  0xfd   : > { %611 = vadd.xlane.f32.xlu0 %v405_v20  ;;  %v1364_v32 = vsel %vm1363_vm5, %v868_v26, %v1362_v59  ;;  %v419_v59 = vmul.f32 %v291_v54, %v2039_v0  ;;  %v431_v26 = vmul.f32 %v303_v21, %v2039_v0 }
  0xfe   : > { %v1370_v28 = vsel %vm1359_vm3, %v892_v25, %v1369_v13  ;;  %623 = vadd.xlane.f32.xlu1 %v411_v19  ;;  %v492_v34 = vpop.xlane.xlu0 %491 }
  0xff   : > { %v470_v33 = vpop.xlane.xlu1 %469  ;;  %v916_v37 = vrot.slane %v492_v34, %v2191_v30 }
 0x100   : > { %v872_v36 = vrot.slane %v470_v33, %v2191_v30 }
 0x101   : > { %v1375_v39 = vsel %vm1355_vm1, %v916_v37, %v1374_v18  ;;  %635 = vadd.xlane.f32.xlu0 %v417_v29 }
 0x102   : > { %613 = vadd.xlane.f32.xlu1 %v406_v27  ;;  %v2253_v42 = vsel %vm1365_vm6, %v872_v36, %v1364_v32  ;;  %v482_v44 = vpop.xlane.xlu0 %481  ;;  %v293_v32 = vld [vmem:[%s2032_s7 + $0x2f0] sm:$0xff]  ;;  %v427_v36 = vmul.f32 %v299_v31, %v2039_v0 }
 0x103   : > { %v494_v43 = vpop.xlane.xlu1 %493  ;;  %v896_v47 = vrot.slane %v482_v44, %v2191_v30  ;;  %v421_v37 = vmul.f32 %v293_v32, %v2039_v0 }
 0x104   : > { %v920_v46 = vrot.slane %v494_v43, %v2191_v30 }
 0x105   : > { %625 = vadd.xlane.f32.xlu0 %v412_v40  ;;  %v1371_v51 = vsel %vm1361_vm4, %v896_v47, %v1370_v28  ;;  %v433_v47 = vmul.f32 %v305_v41, %v2039_v0 }
 0x106   : > { %v1376_v49 = vsel %vm1357_vm2, %v920_v46, %v1375_v39  ;;  %637 = vadd.xlane.f32.xlu1 %v418_v38  ;;  %v504_v53 = vpop.xlane.xlu0 %503  ;;  %v294_v38 = vld [vmem:[%s2032_s7 + $0x2f8] sm:$0xff] }
 0x107   : > { %v506_v52 = vpop.xlane.xlu1 %505  ;;  %v940_v57 = vrot.slane %v504_v53, %v2191_v30  ;;  %v422_v45 = vmul.f32 %v294_v38, %v2039_v0  ;;  %v319_v38 = vld [vmem:[%s2032_s7 + $0x3c0] sm:$0xff] }
 0x108   : > { %v944_v56 = vrot.slane %v506_v52, %v2191_v30  ;;  %v300_v52 = vld [vmem:[%s2032_s7 + $0x328] sm:$0xff] }
 0x109   : > { %647 = vadd.xlane.f32.xlu0 %v423_v50  ;;  %v428_v54 = vmul.f32 %v300_v52, %v2039_v0 }
 0x10a   : > { %v1381_v58 = vsel %vm1353_vm0, %v944_v56, %v940_v57  ;;  %649 = vadd.xlane.f32.xlu1 %v424_v48  ;;  %v484_v63 = vpop.xlane.xlu0 %483  ;;  %v312_v57 = vld [vmem:[%s2032_s7 + $0x388] sm:$0xff] }
 0x10b   : > { %v496_v62 = vpop.xlane.xlu1 %495  ;;  %v900_v3 = vrot.slane %v484_v63, %v2191_v30  ;;  %v440_v61 = vmul.f32 %v312_v57, %v2039_v0  ;;  %v310_v57 = vld [vmem:[%s2032_s7 + $0x378] sm:$0xff] }
 0x10c   : > { %v924_v2 = vrot.slane %v496_v62, %v2191_v30 }
 0x10d   : > { %627 = vadd.xlane.f32.xlu0 %v413_v60  ;;  %v1372_v8 = vsel %vm1363_vm5, %v900_v3, %v1371_v51  ;;  %v306_v51 = vld [vmem:[%s2032_s7 + $0x358] sm:$0xff]  ;;  %v301_v3 = vld [vmem:[%s2032_s7 + $0x330] sm:$0xff] }
 0x10e   : > { %v1377_v5 = vsel %vm1359_vm3, %v924_v2, %v1376_v49  ;;  %639 = vadd.xlane.f32.xlu1 %v419_v59  ;;  %v508_v10 = vpop.xlane.xlu0 %507  ;;  %v434_v53 = vmul.f32 %v306_v51, %v2039_v0  ;;  %v307_v2 = vld [vmem:[%s2032_s7 + $0x360] sm:$0xff]  ;;  %v309_v51 = vld [vmem:[%s2032_s7 + $0x370] sm:$0xff] }
 0x10f   : > { %v486_v9 = vpop.xlane.xlu1 %485  ;;  %v948_v13 = vrot.slane %v508_v10, %v2191_v30  ;;  %v429_v10 = vmul.f32 %v301_v3, %v2039_v0  ;;  %v322_v3 = vld [vmem:[%s2032_s7 + $0x3d8] sm:$0xff] }
 0x110   : > { %v904_v12 = vrot.slane %v486_v9, %v2191_v30  ;;  %v435_v9 = vmul.f32 %v307_v2, %v2039_v0 }
 0x111   : > { %v1382_v15 = vsel %vm1355_vm1, %v948_v13, %v1381_v58  ;;  %651 = vadd.xlane.f32.xlu0 %v425_v6  ;;  %v311_v58 = vld [vmem:[%s2032_s7 + $0x380] sm:$0xff] }
 0x112   : > { %629 = vadd.xlane.f32.xlu1 %v414_v4  ;;  %v2286_v18 = vsel %vm1365_vm6, %v904_v12, %v1372_v8  ;;  %v498_v20 = vpop.xlane.xlu0 %497  ;;  %v439_v62 = vmul.f32 %v311_v58, %v2039_v0 }
 0x113   : > { %v510_v19 = vpop.xlane.xlu1 %509  ;;  %v928_v23 = vrot.slane %v498_v20, %v2191_v30  ;;  %v430_v20 = vmul.f32 %v302_v11, %v2039_v0 }
 0x114   : > { %v952_v22 = vrot.slane %v510_v19, %v2191_v30 }
 0x115   : > { %641 = vadd.xlane.f32.xlu0 %v420_v16  ;;  %v1378_v27 = vsel %vm1361_vm4, %v928_v23, %v1377_v5  ;;  %v314_v23 = vld [vmem:[%s2032_s7 + $0x398] sm:$0xff] }
 0x116   : > { %v1383_v25 = vsel %vm1357_vm2, %v952_v22, %v1382_v15  ;;  %653 = vadd.xlane.f32.xlu1 %v426_v14  ;;  %v520_v29 = vpop.xlane.xlu0 %519  ;;  %v313_v14 = vld [vmem:[%s2032_s7 + $0x390] sm:$0xff]  ;;  %v442_v31 = vmul.f32 %v314_v23, %v2039_v0 }
 0x117   : > { %v522_v28 = vpop.xlane.xlu1 %521  ;;  %v972_v34 = vrot.slane %v520_v29, %v2191_v30  ;;  %v441_v22 = vmul.f32 %v313_v14, %v2039_v0 }
 0x118   : > { %v976_v33 = vrot.slane %v522_v28, %v2191_v30 }
 0x119   : > { %663 = vadd.xlane.f32.xlu0 %v431_v26 }
 0x11a   : > { %v1388_v35 = vsel %vm1353_vm0, %v976_v33, %v972_v34  ;;  %665 = vadd.xlane.f32.xlu1 %v432_v24  ;;  %v500_v40 = vpop.xlane.xlu0 %499  ;;  %v320_v34 = vld [vmem:[%s2032_s7 + $0x3c8] sm:$0xff] }
 0x11b   : > { %v512_v39 = vpop.xlane.xlu1 %511  ;;  %v932_v44 = vrot.slane %v500_v40, %v2191_v30  ;;  %v448_v41 = vmul.f32 %v320_v34, %v2039_v0 }
 0x11c   : > { %v956_v43 = vrot.slane %v512_v39, %v2191_v30 }
 0x11d   : > { %643 = vadd.xlane.f32.xlu0 %v421_v37  ;;  %v2310_v48 = vsel %vm1363_vm5, %v932_v44, %v1378_v27  ;;  %v308_v27 = vld [vmem:[%s2032_s7 + $0x368] sm:$0xff] }
 0x11e   : > { %v1384_v46 = vsel %vm1359_vm3, %v956_v43, %v1383_v25  ;;  %655 = vadd.xlane.f32.xlu1 %v427_v36  ;;  %v524_v50 = vpop.xlane.xlu0 %523  ;;  %v436_v33 = vmul.f32 %v308_v27, %v2039_v0  ;;  %v324_v27 = vld [vmem:[%s2032_s7 + $0x3e8] sm:$0xff] }
 0x11f   : > { %v2312_v49 = vpop.xlane.xlu1 %501  ;;  %v980_v4 = vrot.slane %v524_v50, %v2191_v30  ;;  %v315_v50 = vld [vmem:[%s2032_s7 + $0x3a0] sm:$0xff] }
 0x121   : > { %667 = vadd.xlane.f32.xlu0 %v433_v47  ;;  %v1389_v15 = vsel %vm1355_vm1, %v980_v4, %v1388_v35 }
 0x122   : > { %645 = vadd.xlane.f32.xlu1 %v422_v45  ;;  %v514_v56 = vpop.xlane.xlu0 %513  ;;  %v447_v45 = vmul.f32 %v319_v38, %v2039_v0 }
 0x123   : > { %v526_v55 = vpop.xlane.xlu1 %525  ;;  %v960_v59 = vrot.slane %v514_v56, %v2191_v30  ;;  %v437_v56 = vmul.f32 %v309_v51, %v2039_v0 }
 0x124   : > { %v984_v7 = vrot.slane %v526_v55, %v2191_v30  ;;  %v443_v55 = vmul.f32 %v315_v50, %v2039_v0 }
 0x125   : > { %v1385_v60 = vsel %vm1361_vm4, %v960_v59, %v1384_v46  ;;  %657 = vadd.xlane.f32.xlu0 %v428_v54 }
 0x126   : > { %669 = vadd.xlane.f32.xlu1 %v434_v53  ;;  %v536_v1 = vpop.xlane.xlu0 %535  ;;  %v1390_v19 = vsel %vm1357_vm2, %v984_v7, %v1389_v15  ;;  %v316_v7 = vld [vmem:[%s2032_s7 + $0x3a8] sm:$0xff] }
 0x127   : > { %v538_v63 = vpop.xlane.xlu1 %537  ;;  %v1004_v6 = vrot.slane %v536_v1, %v2191_v30 }
 0x128   : > { %v1008_v5 = vrot.slane %v538_v63, %v2191_v30  ;;  %v438_v63 = vmul.f32 %v310_v57, %v2039_v0 }
 0x129   : > { %679 = vadd.xlane.f32.xlu0 %v439_v62 }
 0x12a   : > { %v1395_v8 = vsel %vm1353_vm0, %v1008_v5, %v1004_v6  ;;  %681 = vadd.xlane.f32.xlu1 %v440_v61  ;;  %v516_v13 = vpop.xlane.xlu0 %515 }
 0x12b   : > { %v528_v12 = vpop.xlane.xlu1 %527  ;;  %v964_v17 = vrot.slane %v516_v13, %v2191_v30  ;;  %v323_v13 = vld [vmem:[%s2032_s7 + $0x3e0] sm:$0xff] }
 0x12c   : > { %v988_v16 = vrot.slane %v528_v12, %v2191_v30  ;;  %v444_v12 = vmul.f32 %v316_v7, %v2039_v0 }
 0x12d   : > { %659 = vadd.xlane.f32.xlu0 %v429_v10  ;;  %v1386_v24 = vsel %vm1363_vm5, %v964_v17, %v1385_v60  ;;  %v321_v60 = vld [vmem:[%s2032_s7 + $0x3d0] sm:$0xff]  ;;  %v450_v10 = vmul.f32 %v322_v3, %v2039_v0 }
 0x12e   : > { %v1391_v21 = vsel %vm1359_vm3, %v988_v16, %v1390_v19  ;;  %671 = vadd.xlane.f32.xlu1 %v435_v9  ;;  %v540_v26 = vpop.xlane.xlu0 %539  ;;  %v449_v2 = vmul.f32 %v321_v60, %v2039_v0  ;;  %v317_v17 = vld [vmem:[%s2032_s7 + $0x3b0] sm:$0xff] }
 0x12f   : > { %v518_v25 = vpop.xlane.xlu1 %517  ;;  %v1012_v29 = vrot.slane %v540_v26, %v2191_v30 }
 0x130   : > { %v968_v28 = vrot.slane %v518_v25, %v2191_v30 }
 0x131   : > { %v1396_v32 = vsel %vm1355_vm1, %v1012_v29, %v1395_v8  ;;  %683 = vadd.xlane.f32.xlu0 %v441_v22 }
 0x132   : > { %661 = vadd.xlane.f32.xlu1 %v430_v20  ;;  %v2352_v35 = vsel %vm1365_vm6, %v968_v28, %v1386_v24  ;;  %v530_v37 = vpop.xlane.xlu0 %529  ;;  %v318_v28 = vld [vmem:[%s2032_s7 + $0x3b8] sm:$0xff] }
 0x133   : > { %v542_v36 = vpop.xlane.xlu1 %541  ;;  %v992_v40 = vrot.slane %v530_v37, %v2191_v30 }
 0x134   : > { %v1016_v39 = vrot.slane %v542_v36, %v2191_v30  ;;  %v325_v36 = vld [vmem:[%s2032_s7 + $0x3f0] sm:$0xff] }
 0x135   : > { %v1392_v44 = vsel %vm1361_vm4, %v992_v40, %v1391_v21  ;;  %673 = vadd.xlane.f32.xlu0 %v436_v33  ;;  %v1713_v21 = vld [vmem:[%s2024_s19] sm:$0xff] }
 0x136   : > { %v1397_v43 = vsel %vm1357_vm2, %v1016_v39, %v1396_v32  ;;  %685 = vadd.xlane.f32.xlu1 %v442_v31  ;;  %v552_v47 = vpop.xlane.xlu0 %551  ;;  %v451_v22 = vmul.f32 %v1713_v21, %v323_v13  ;;  %v445_v24 = vmul.f32 %v1713_v21, %v317_v17  ;;  %v452_v33 = vmul.f32 %v1713_v21, %v324_v27  ;;  %v326_v39 = vld [vmem:[%s2032_s7 + $0x3f8] sm:$0xff] }
 0x137   : > { %v554_v46 = vpop.xlane.xlu1 %553  ;;  %v1036_v53 = vrot.slane %v552_v47, %v2191_v30  ;;  %v446_v34 = vmul.f32 %v1713_v21, %v318_v28 }
 0x138   : > { %v1040_v52 = vrot.slane %v554_v46, %v2191_v30 }
 0x139   : > { %695 = vadd.xlane.f32.xlu0 %v447_v45  ;;  %v454_v45 = vmul.f32 %v1713_v21, %v326_v39 }
 0x13a   : > { %v1402_v54 = vsel %vm1353_vm0, %v1040_v52, %v1036_v53  ;;  %697 = vadd.xlane.f32.xlu1 %v448_v41  ;;  %v532_v59 = vpop.xlane.xlu0 %531 }
 0x13b   : > { %v544_v58 = vpop.xlane.xlu1 %543  ;;  %v996_v62 = vrot.slane %v532_v59, %v2191_v30 }
 0x13c   : > { %v1020_v61 = vrot.slane %v544_v58, %v2191_v30 }
 0x13d   : > { %675 = vadd.xlane.f32.xlu0 %v437_v56  ;;  %v1393_v4 = vsel %vm1363_vm5, %v996_v62, %v1392_v44 }
 0x13e   : > { %v1398_v1 = vsel %vm1359_vm3, %v1020_v61, %v1397_v43  ;;  %687 = vadd.xlane.f32.xlu1 %v443_v55  ;;  %v556_v6 = vpop.xlane.xlu0 %555  ;;  %v453_v43 = vmul.f32 %v1713_v21, %v325_v36 }
 0x13f   : > { %v534_v5 = vpop.xlane.xlu1 %533  ;;  %v1044_v9 = vrot.slane %v556_v6, %v2191_v30 }
 0x140   : > { %v1000_v8 = vrot.slane %v534_v5, %v2191_v30 }
 0x141   : > { %v1403_v11 = vsel %vm1355_vm1, %v1044_v9, %v1402_v54  ;;  %699 = vadd.xlane.f32.xlu0 %v449_v2 }
 0x142   : > { %677 = vadd.xlane.f32.xlu1 %v438_v63  ;;  %v2385_v14 = vsel %vm1365_vm6, %v1000_v8, %v1393_v4  ;;  %v546_v16 = vpop.xlane.xlu0 %545 }
 0x143   : > { %v558_v15 = vpop.xlane.xlu1 %557  ;;  %v1024_v20 = vrot.slane %v546_v16, %v2191_v30 }
 0x144   : > { %v1048_v19 = vrot.slane %v558_v15, %v2191_v30 }
 0x145   : > { %v1399_v0 = vsel %vm1361_vm4, %v1024_v20, %v1398_v1  ;;  %689 = vadd.xlane.f32.xlu0 %v444_v12  ;;  %v936_v20 = vrot.slane %v2312_v49, %v2191_v30 }
 0x146   : > { %v1404_v23 = vsel %vm1357_vm2, %v1048_v19, %v1403_v11  ;;  %701 = vadd.xlane.f32.xlu1 %v450_v10  ;;  %v568_v26 = vpop.xlane.xlu0 %567 }
 0x147   : > { %v570_v25 = vpop.xlane.xlu1 %569  ;;  %v1068_v31 = vrot.slane %v568_v26, %v2191_v30 }
 0x148   : > { %v1072_v29 = vrot.slane %v570_v25, %v2191_v30 }
 0x149   : > { %691 = vadd.xlane.f32.xlu0 %v445_v24 }
 0x14a   : > { %v1409_v32 = vsel %vm1353_vm0, %v1072_v29, %v1068_v31  ;;  %703 = vadd.xlane.f32.xlu1 %v451_v22  ;;  %v548_v38 = vpop.xlane.xlu0 %547 }
 0x14b   : > { %v560_v37 = vpop.xlane.xlu1 %559  ;;  %v1028_v41 = vrot.slane %v548_v38, %v2191_v30 }
 0x14c   : > { %v1052_v40 = vrot.slane %v560_v37, %v2191_v30 }
 0x14d   : > { %693 = vadd.xlane.f32.xlu0 %v446_v34  ;;  %v1400_v46 = vsel %vm1363_vm5, %v1028_v41, %v1399_v0 }
 0x14e   : > { %v1405_v44 = vsel %vm1359_vm3, %v1052_v40, %v1404_v23  ;;  %705 = vadd.xlane.f32.xlu1 %v452_v33  ;;  %v572_v50 = vpop.xlane.xlu0 %571  ;;  %v1380_v23 = vsel %vm1365_vm6, %v936_v20, %v2310_v48 }
 0x14f   : > { %v550_v47 = vpop.xlane.xlu1 %549  ;;  %v1076_v52 = vrot.slane %v572_v50, %v2191_v30 }
 0x150   : > { %v1032_v51 = vrot.slane %v550_v47, %v2191_v30 }
 0x151   : > { %v1410_v53 = vsel %vm1355_vm1, %v1076_v52, %v1409_v32  ;;  %707 = vadd.xlane.f32.xlu0 %v453_v43 }
 0x152   : > { %709 = vadd.xlane.f32.xlu1 %v454_v45  ;;  %v1401_v54 = vsel %vm1365_vm6, %v1032_v51, %v1400_v46  ;;  %v562_v56 = vpop.xlane.xlu0 %561 }
 0x153   : > { %v574_v55 = vpop.xlane.xlu1 %573  ;;  %v1056_v26 = vrot.slane %v562_v56, %v2191_v30 }
 0x154   : > { %v1080_v57 = vrot.slane %v574_v55, %v2191_v30 }
 0x155   : > { %v1406_v31 = vsel %vm1361_vm4, %v1056_v26, %v1405_v44 }
 0x156   : > { %v1411_v58 = vsel %vm1357_vm2, %v1080_v57, %v1410_v53  ;;  %v584_v60 = vpop.xlane.xlu0 %583 }
 0x157   : > { %v2410_v59 = vpop.xlane.xlu1 %585  ;;  %v1100_v32 = vrot.slane %v584_v60, %v2191_v30 }
 0x15a   : > { %v564_v62 = vpop.xlane.xlu0 %563 }
 0x15b   : > { %v576_v61 = vpop.xlane.xlu1 %575  ;;  %v1060_v48 = vrot.slane %v564_v62, %v2191_v30 }
 0x15c   : > { %v1084_v28 = vrot.slane %v576_v61, %v2191_v30 }
 0x15d   : > { %v1407_v37 = vsel %vm1363_vm5, %v1060_v48, %v1406_v31 }
 0x15e   : > { %v588_v1 = vpop.xlane.xlu0 %587  ;;  %v1412_v41 = vsel %vm1359_vm3, %v1084_v28, %v1411_v58 }
 0x15f   : > { %v566_v63 = vpop.xlane.xlu1 %565  ;;  %v1108_v34 = vrot.slane %v588_v1, %v2191_v30 }
 0x160   : > { %v1064_v27 = vrot.slane %v566_v63, %v2191_v30 }
 0x162   : > { %v578_v3 = vpop.xlane.xlu0 %577  ;;  %v1408_v40 = vsel %vm1365_vm6, %v1064_v27, %v1407_v37 }
 0x163   : > { %v2412_v2 = vpop.xlane.xlu1 %589  ;;  %v1088_v33 = vrot.slane %v578_v3, %v2191_v30 }
 0x164   : > { %v1112_v38 = vrot.slane %v2412_v2, %v2191_v30 }
 0x165   : > { %v1413_v51 = vsel %vm1361_vm4, %v1088_v33, %v1412_v41 }
 0x166   : > { %v2416_v5 = vpop.xlane.xlu0 %599 }
 0x167   : > { %v2414_v4 = vpop.xlane.xlu1 %601  ;;  %v1132_v44 = vrot.slane %v2416_v5, %v2191_v30 }
 0x168   : > { %v1136_v43 = vrot.slane %v2414_v4, %v2191_v30 }
 0x16a   : > { %v580_v7 = vpop.xlane.xlu0 %579  ;;  %v1423_v61 = vsel %vm1353_vm0, %v1136_v43, %v1132_v44 }
 0x16b   : > { %v2418_v6 = vpop.xlane.xlu1 %591  ;;  %v1092_v36 = vrot.slane %v580_v7, %v2191_v30 }
 0x16c   : > { %v1116_v45 = vrot.slane %v2418_v6, %v2191_v30 }
 0x16d   : > { %v1414_v56 = vsel %vm1363_vm5, %v1092_v36, %v1413_v51 }
 0x16e   : > { %v2420_v9 = vpop.xlane.xlu0 %603 }
 0x16f   : > { %v582_v8 = vpop.xlane.xlu1 %581 }
 0x170   : > { %v1096_v39 = vrot.slane %v582_v8, %v2191_v30 }
 0x172   : > { %v2424_v11 = vpop.xlane.xlu0 %593  ;;  %v1415_v60 = vsel %vm1365_vm6, %v1096_v39, %v1414_v56 }
 0x173   : > { %v2422_v10 = vpop.xlane.xlu1 %605  ;;  %v1120_v52 = vrot.slane %v2424_v11, %v2191_v30 }
 0x174   : > { %v1144_v58 = vrot.slane %v2422_v10, %v2191_v30 }
 0x176   : > { %v2428_v13 = vpop.xlane.xlu0 %615 }
 0x177   : > { %v2426_v12 = vpop.xlane.xlu1 %617  ;;  %v1164_v5 = vrot.slane %v2428_v13, %v2191_v30 }
 0x178   : > { %v1168_v4 = vrot.slane %v2426_v12, %v2191_v30 }
 0x17a   : > { %v2432_v16 = vpop.xlane.xlu0 %595 }
 0x17b   : > { %v2430_v15 = vpop.xlane.xlu1 %607  ;;  %v1124_v55 = vrot.slane %v2432_v16, %v2191_v30 }
 0x17c   : > { %v1148_v63 = vrot.slane %v2430_v15, %v2191_v30 }
 0x17e   : > { %1488 = vxpose.xlu0.b32.start [1/16] (narrow) %v2253_v42, 8  ;;  %v2437_v19 = vpop.xlane.xlu0 %619 }
 0x17f   : > { %v2434_v17 = vpop.xlane.xlu1 %597  ;;  %v1172_v8 = vrot.slane %v2437_v19, %v2191_v30 }
 0x182   : > { %1489 = vxpose.xlu0.b32.cont [2/16] (narrow) %v2286_v18, 8  ;;  %v2444_v22 = vpop.xlane.xlu0 %609 }
 0x183   : > { %v2441_v21 = vpop.xlane.xlu1 %621  ;;  %v1152_v6 = vrot.slane %v2444_v22, %v2191_v30  ;;  %v1430_v22 = vsel %vm1353_vm0, %v1168_v4, %v1164_v5 }
 0x184   : > { %v1176_v12 = vrot.slane %v2441_v21, %v2191_v30 }
 0x186   : > { %1490 = vxpose.xlu0.b32.cont [3/16] (narrow) %v1380_v23, 8  ;;  %v2450_v24 = vpop.xlane.xlu0 %631 }
 0x187   : > { %v2448_v0 = vpop.xlane.xlu1 %633 }
 0x188   : > { %v1200_v37 = vrot.slane %v2448_v0, %v2191_v30 }
 0x18a   : > { %1491 = vxpose.xlu0.b32.cont [4/16] (narrow) %v2352_v35, 8  ;;  %v2455_v25 = vpop.xlane.xlu0 %611 }
 0x18b   : > { %v2452_v42 = vpop.xlane.xlu1 %623 }
 0x18e   : > { %1492 = vxpose.xlu0.b32.cont [5/16] (narrow) %v2385_v14, 8  ;;  %v2460_v18 = vpop.xlane.xlu0 %635  ;;  %v1104_v14 = vrot.slane %v2410_v59, %v2191_v30  ;;  %v1128_v59 = vrot.slane %v2434_v17, %v2191_v30  ;;  %v1180_v17 = vrot.slane %v2452_v42, %v2191_v30 }
 0x18f   : > { %v2457_v49 = vpop.xlane.xlu1 %613  ;;  %v1204_v39 = vrot.slane %v2460_v18, %v2191_v30 }
 0x190   : > { %v1416_v50 = vsel %vm1353_vm0, %v1104_v14, %v1100_v32  ;;  %v1160_v13 = vrot.slane %v2457_v49, %v2191_v30 }
 0x191   : > { %v1417_v53 = vsel %vm1355_vm1, %v1108_v34, %v1416_v50 }
 0x192   : > { %1493 = vxpose.xlu0.b32.cont [6/16] (narrow) %v1401_v54, 8  ;;  %v2468_v35 = vpop.xlane.xlu0 %625  ;;  %v1140_v54 = vrot.slane %v2420_v9, %v2191_v30  ;;  %v1418_v57 = vsel %vm1357_vm2, %v1112_v38, %v1417_v53  ;;  %v1156_v9 = vrot.slane %v2455_v25, %v2191_v30  ;;  %v1431_v25 = vsel %vm1355_vm1, %v1172_v8, %v1430_v22 }
 0x193   : > { %v2466_v29 = vpop.xlane.xlu1 %637  ;;  %v1419_v62 = vsel %vm1359_vm3, %v1116_v45, %v1418_v57  ;;  %v1184_v21 = vrot.slane %v2468_v35, %v2191_v30  ;;  %v1432_v48 = vsel %vm1357_vm2, %v1176_v12, %v1431_v25  ;;  %v1196_v38 = vrot.slane %v2450_v24, %v2191_v30 }
 0x194   : > { %v1420_v3 = vsel %vm1361_vm4, %v1120_v52, %v1419_v62  ;;  %v1424_v7 = vsel %vm1355_vm1, %v1140_v54, %v1423_v61  ;;  %v1433_v28 = vsel %vm1359_vm3, %v1180_v17, %v1432_v48 }
 0x195   : > { %v1421_v10 = vsel %vm1363_vm5, %v1124_v55, %v1420_v3  ;;  %v1425_v11 = vsel %vm1357_vm2, %v1144_v58, %v1424_v7  ;;  %v1434_v32 = vsel %vm1361_vm4, %v1184_v21, %v1433_v28  ;;  %v1437_v45 = vsel %vm1353_vm0, %v1200_v37, %v1196_v38 }
 0x196   : > { %1494 = vxpose.xlu0.b32.cont [7/16] (narrow) %v1408_v40, 8  ;;  %v2491_v47 = vpop.xlane.xlu0 %647  ;;  %v1422_v15 = vsel %vm1365_vm6, %v1128_v59, %v1421_v10  ;;  %v1426_v16 = vsel %vm1359_vm3, %v1148_v63, %v1425_v11  ;;  %v1208_v40 = vrot.slane %v2466_v29, %v2191_v30  ;;  %v1438_v51 = vsel %vm1355_vm1, %v1204_v39, %v1437_v45 }
 0x197   : > { %v2489_v46 = vpop.xlane.xlu1 %649  ;;  %v1427_v23 = vsel %vm1361_vm4, %v1152_v6, %v1426_v16  ;;  %v1228_v62 = vrot.slane %v2491_v47, %v2191_v30 }
 0x198   : > { %v1428_v26 = vsel %vm1363_vm5, %v1156_v9, %v1427_v23  ;;  %v1439_v24 = vsel %vm1357_vm2, %v1208_v40, %v1438_v51  ;;  %v1232_v61 = vrot.slane %v2489_v46, %v2191_v30 }
 0x199   : > { %v1429_v27 = vsel %vm1365_vm6, %v1160_v13, %v1428_v26 }
 0x19a   : > { %1495 = vxpose.xlu0.b32.cont [8/16] (narrow) %v1415_v60, 8  ;;  %v628_v2 = vpop.xlane.xlu0 %627  ;;  %v1444_v5 = vsel %vm1353_vm0, %v1232_v61, %v1228_v62 }
 0x19b   : > { %v640_v1 = vpop.xlane.xlu1 %639  ;;  %v1188_v49 = vrot.slane %v628_v2, %v2191_v30 }
 0x19c   : > { %v1212_v41 = vrot.slane %v640_v1, %v2191_v30 }
 0x19d   : > { %v1435_v35 = vsel %vm1363_vm5, %v1188_v49, %v1434_v32 }
 0x19e   : > { %1496 = vxpose.xlu0.b32.cont [9/16] (narrow) %v1422_v15, 8  ;;  %v652_v20 = vpop.xlane.xlu0 %651  ;;  %v1440_v52 = vsel %vm1359_vm3, %v1212_v41, %v1439_v24 }
 0x19f   : > { %v630_v19 = vpop.xlane.xlu1 %629  ;;  %v1236_v63 = vrot.slane %v652_v20, %v2191_v30 }
 0x1a0   : > { %v1192_v42 = vrot.slane %v630_v19, %v2191_v30 }
 0x1a1   : > { %v1445_v7 = vsel %vm1355_vm1, %v1236_v63, %v1444_v5 }
 0x1a2   : > { %1497 = vxpose.xlu0.b32.cont [10/16] (narrow) %v1429_v27, 8  ;;  %v642_v14 = vpop.xlane.xlu0 %641  ;;  %v1436_v33 = vsel %vm1365_vm6, %v1192_v42, %v1435_v35 }
 0x1a3   : > { %v654_v31 = vpop.xlane.xlu1 %653  ;;  %v1216_v50 = vrot.slane %v642_v14, %v2191_v30 }
 0x1a4   : > { %v1240_v1 = vrot.slane %v654_v31, %v2191_v30 }
 0x1a5   : > { %v1441_v29 = vsel %vm1361_vm4, %v1216_v50, %v1440_v52 }
 0x1a6   : > { %1498 = vxpose.xlu0.b32.cont [11/16] (narrow) %v1436_v33, 8  ;;  %v664_v36 = vpop.xlane.xlu0 %663  ;;  %v1446_v46 = vsel %vm1357_vm2, %v1240_v1, %v1445_v7 }
 0x1a7   : > { %v666_v34 = vpop.xlane.xlu1 %665  ;;  %v1260_v23 = vrot.slane %v664_v36, %v2191_v30 }
 0x1a8   : > { %v1264_v22 = vrot.slane %v666_v34, %v2191_v30 }
 0x1aa   : > { %v644_v44 = vpop.xlane.xlu0 %643  ;;  %v1451_v42 = vsel %vm1353_vm0, %v1264_v22, %v1260_v23 }
 0x1ab   : > { %v656_v43 = vpop.xlane.xlu1 %655  ;;  %v1220_v0 = vrot.slane %v644_v44, %v2191_v30 }
 0x1ac   : > { %v1244_v2 = vrot.slane %v656_v43, %v2191_v30 }
 0x1ad   : > { %v1442_v55 = vsel %vm1363_vm5, %v1220_v0, %v1441_v29 }
 0x1ae   : > { %v668_v53 = vpop.xlane.xlu0 %667  ;;  %v1447_v47 = vsel %vm1359_vm3, %v1244_v2, %v1446_v46 }
 0x1af   : > { %v646_v18 = vpop.xlane.xlu1 %645  ;;  %v1268_v21 = vrot.slane %v668_v53, %v2191_v30 }
 0x1b0   : > { %v1224_v54 = vrot.slane %v646_v18, %v2191_v30 }
 0x1b1   : > { %v1452_v28 = vsel %vm1355_vm1, %v1268_v21, %v1451_v42 }
 0x1b2   : > { %v1443_v56 = vsel %vm1365_vm6, %v1224_v54, %v1442_v55  ;;  %v658_v58 = vpop.xlane.xlu0 %657 }
 0x1b3   : > { %v670_v57 = vpop.xlane.xlu1 %669  ;;  %1499 = vxpose.xlu0.b32.cont [12/16] (narrow) %v1443_v56, 8  ;;  %v1248_v6 = vrot.slane %v658_v58, %v2191_v30 }
 0x1b4   : > { %v1272_v25 = vrot.slane %v670_v57, %v2191_v30 }
 0x1b5   : > { %v1448_v11 = vsel %vm1361_vm4, %v1248_v6, %v1447_v47 }
 0x1b6   : > { %v680_v60 = vpop.xlane.xlu0 %679  ;;  %v1453_v14 = vsel %vm1357_vm2, %v1272_v25, %v1452_v28 }
 0x1b7   : > { %v682_v59 = vpop.xlane.xlu1 %681  ;;  %v1292_v43 = vrot.slane %v680_v60, %v2191_v30 }
 0x1b8   : > { %v1296_v41 = vrot.slane %v682_v59, %v2191_v30 }
 0x1ba   : > { %v660_v4 = vpop.xlane.xlu0 %659  ;;  %v1458_v24 = vsel %vm1353_vm0, %v1296_v41, %v1292_v43 }
 0x1bb   : > { %v672_v3 = vpop.xlane.xlu1 %671  ;;  %v1252_v8 = vrot.slane %v660_v4, %v2191_v30 }
 0x1bc   : > { %v1276_v49 = vrot.slane %v672_v3, %v2191_v30 }
 0x1bd   : > { %v1449_v13 = vsel %vm1363_vm5, %v1252_v8, %v1448_v11 }
 0x1be   : > { %v684_v10 = vpop.xlane.xlu0 %683  ;;  %v1454_v32 = vsel %vm1359_vm3, %v1276_v49, %v1453_v14 }
 0x1bf   : > { %v662_v9 = vpop.xlane.xlu1 %661  ;;  %v1300_v44 = vrot.slane %v684_v10, %v2191_v30 }
 0x1c0   : > { %v1256_v12 = vrot.slane %v662_v9, %v2191_v30 }
 0x1c1   : > { %v1459_v18 = vsel %vm1355_vm1, %v1300_v44, %v1458_v24 }
 0x1c2   : > { %v1450_v15 = vsel %vm1365_vm6, %v1256_v12, %v1449_v13  ;;  %v674_v17 = vpop.xlane.xlu0 %673 }
 0x1c3   : > { %v686_v16 = vpop.xlane.xlu1 %685  ;;  %1500 = vxpose.xlu0.b32.cont [13/16] (narrow) %v1450_v15, 8  ;;  %v1280_v27 = vrot.slane %v674_v17, %v2191_v30 }
 0x1c4   : > { %v1304_v45 = vrot.slane %v686_v16, %v2191_v30 }
 0x1c5   : > { %v1455_v34 = vsel %vm1361_vm4, %v1280_v27, %v1454_v32 }
 0x1c6   : > { %v696_v20 = vpop.xlane.xlu0 %695  ;;  %v1460_v55 = vsel %vm1357_vm2, %v1304_v45, %v1459_v18 }
 0x1c7   : > { %v698_v19 = vpop.xlane.xlu1 %697  ;;  %v1324_v29 = vrot.slane %v696_v20, %v2191_v30 }
 0x1c8   : > { %v1328_v53 = vrot.slane %v698_v19, %v2191_v30 }
 0x1ca   : > { %v676_v48 = vpop.xlane.xlu0 %675  ;;  %v1465_v1 = vsel %vm1353_vm0, %v1328_v53, %v1324_v29 }
 0x1cb   : > { %v688_v26 = vpop.xlane.xlu1 %687  ;;  %v1284_v31 = vrot.slane %v676_v48, %v2191_v30 }
 0x1cc   : > { %v1308_v50 = vrot.slane %v688_v26, %v2191_v30 }
 0x1cd   : > { %v1456_v37 = vsel %vm1363_vm5, %v1284_v31, %v1455_v34 }
 0x1ce   : > { %v700_v33 = vpop.xlane.xlu0 %699  ;;  %v1461_v57 = vsel %vm1359_vm3, %v1308_v50, %v1460_v55 }
 0x1cf   : > { %v678_v35 = vpop.xlane.xlu1 %677  ;;  %v1332_v56 = vrot.slane %v700_v33, %v2191_v30 }
 0x1d0   : > { %v1288_v36 = vrot.slane %v678_v35, %v2191_v30 }
 0x1d1   : > { %v1466_v4 = vsel %vm1355_vm1, %v1332_v56, %v1465_v1 }
 0x1d2   : > { %v1457_v38 = vsel %vm1365_vm6, %v1288_v36, %v1456_v37  ;;  %v690_v40 = vpop.xlane.xlu0 %689 }
 0x1d3   : > { %v702_v39 = vpop.xlane.xlu1 %701  ;;  %1501 = vxpose.xlu0.b32.cont [14/16] (narrow) %v1457_v38, 8  ;;  %v1312_v52 = vrot.slane %v690_v40, %v2191_v30 }
 0x1d4   : > { %v1336_v58 = vrot.slane %v702_v39, %v2191_v30 }
 0x1d5   : > { %v1462_v61 = vsel %vm1361_vm4, %v1312_v52, %v1461_v57 }
 0x1d6   : > { %v692_v0 = vpop.xlane.xlu0 %691  ;;  %v1467_v6 = vsel %vm1357_vm2, %v1336_v58, %v1466_v4 }
 0x1d7   : > { %v704_v51 = vpop.xlane.xlu1 %703  ;;  %v1316_v54 = vrot.slane %v692_v0, %v2191_v30 }
 0x1d8   : > { %v1340_v62 = vrot.slane %v704_v51, %v2191_v30 }
 0x1d9   : > { %v1463_v3 = vsel %vm1363_vm5, %v1316_v54, %v1462_v61 }
 0x1da   : > { %v694_v60 = vpop.xlane.xlu0 %693  ;;  %v1468_v46 = vsel %vm1359_vm3, %v1340_v62, %v1467_v6 }
 0x1db   : > { %v706_v59 = vpop.xlane.xlu1 %705  ;;  %v1320_v63 = vrot.slane %v694_v60, %v2191_v30 }
 0x1dc   : > { %v1344_v2 = vrot.slane %v706_v59, %v2191_v30 }
 0x1dd   : > { %v1464_v5 = vsel %vm1365_vm6, %v1320_v63, %v1463_v3 }
 0x1de   : > { %1502 = vxpose.xlu0.b32.cont [15/16] (narrow) %v1464_v5, 8  ;;  %v708_v7 = vpop.xlane.xlu0 %707  ;;  %v1469_v10 = vsel %vm1361_vm4, %v1344_v2, %v1468_v46 }
 0x1df   : > { %v710_v8 = vpop.xlane.xlu1 %709  ;;  %v1348_v47 = vrot.slane %v708_v7, %v2191_v30 }
 0x1e0   : > { %v1352_v9 = vrot.slane %v710_v8, %v2191_v30 }
 0x1e1   : > { %v1470_v11 = vsel %vm1363_vm5, %v1348_v47, %v1469_v10 }
 0x1e2   : > { %v1471_v12 = vsel %vm1365_vm6, %v1352_v9, %v1470_v11 }
 0x1e3   : > { %1503 = vxpose.xlu0.b32.end [16/16] (narrow) %v1471_v12, 8 }
 0x227   : > { %v1504_v13 = vpop.trf.xlu0 }
 0x228   : > { %1520 = vmax.xlane.f32.xlu1 %v1504_v13 }
 0x2b5   : > { %v1521_v15 = vpop.xlane.xlu1 %1520 }
 0x2b6   : > { %v1522_v16 = vsub.f32 %v1504_v13, %v1521_v15 }
 0x2b8   : > { %v1523_v17 = vmul.f32 1.442695, %v1522_v16 }
 0x2ba   : > { %1709 = vpow2.f32 %v1523_v17 }
 0x2c4   : > { %v1710_v19 = vpop.eup %1709 }
 0x2c5   : > { %1525 = vadd.xlane.f32.xlu1 %v1710_v19 }
 0x352   : > { %v1526_v20 = vpop.xlane.xlu1 %1525 }
 0x353   : > { %1711 = vrcp.f32 %v1526_v20 }
 0x35d   : > { %v1712_v30 = vpop.eup %1711 }
 0x35e   : > { %v1528_v22 = vmul.f32 %v1712_v30, %v1526_v20 }
 0x360   : > { %v1529_v23 = vsub.f32 2.0, %v1528_v22 }
 0x362   : > { %v1530_v21 = vmul.f32 %v1712_v30, %v1529_v23 }
 0x364   : > { %v1531_v25 = vmul.f32 %v1710_v19, %v1530_v21 }
 0x366   : > { %1532 = vst [vmem:[%s197_s14] sm:$0xff] %v1531_v25 }
 0x367   : > { %1787 = shalt.err (!%p1784_p11)
}
 0x368   : > { %s1788_s8 = scalar_lea.hbm %s2636_s25, 128  ;;  %s1792_s5 = scalar_lea.hbm %s2682_s2, 256 }
 0x369   : > { %p1789_p3 = scmp.ne.s32.totalorder %s2636_s25, %s1788_s8  ;;  %p1793_p2 = scmp.lt.u32.totalorder %s2636_s25, %s2682_s2 }
 0x36a   : > { %p1794_p4 = scmp.lt.u32.totalorder %s1792_s5, %s1788_s8  ;;  %p1796_p13 = scmp.lt.u32.totalorder %s1788_s8, %s2636_s25 }
 0x36b   : > { %p1790_p8 = pnand %p1789_p3, %p2692_p1 }
 0x36c   : > { %p1795_p6 = por %p1794_p4, %p1793_p2 }
 0x36d   : > { %p1791_p0 = pneg %p1790_p8 }
 0x36e   : > { %p1797_p12 = por %p1796_p13, %p1795_p6 }
 0x370   : > { %p1798_p10 = pnand %p1797_p12, %p1791_p0 }
 0x372   : > { %1801 = shalt.err (!%p1798_p10)
}
 0x373   : > { %1659 = dma.vmem_to_hbm [thread:$0]  (%p2692_p1), %s2638_s16, 128, %s2636_s25, %s1534_s26  }
 0x374 PF: > { %s1559_s23 = sand.u32 1, %s1832_s9   ;;  %p2693_p5 = scmp.ne.s32.totalorder %s2688_s22, 0 }
 0x375   : > { %p2694_p7 = scmp.ge.s32.totalorder %s1844_s12, 2  ;;  %s1560_s3 = scalar_lea.sflag [#allocation4], %s1559_s23 }
 0x377   : > { %p1669_p9 = pnand %p2694_p7, %p2693_p5 }
 0x379   : > { %1827 = dma.done.wait (!%p1669_p9), %s1560_s3, 128  }
 0x37a   : > { %1829 = vsyncadd (!%p1669_p9), %s1560_s3, 4294967168  ;;  %p18_p11 = scmp.ge.s32.totalorder %s1892_s15, 4   ;;  %s2695_s9 = smov %s1836_s10 }
 0x37b   : > { %s2696_s10 = smov %s1840_s11  ;;  %s2697_s11 = smov %s1904_s18 }
 0x37c   : > { %s2698_s12 = smov %s1892_s15  ;;  %20 = sbr.rel (!%p18_p11) target bundleno = 7 (0x7), region = 86 }
 0x383   :  { %1565 = vsyncpa [#allocation3], 1 }
 0x384   :  { %1567 = vsyncpa [#allocation3 + $0x1], 1 }
 0x385   :  { %1568 = vsyncpa [#allocation6], 1 }
 0x386   :  { %1570 = vsyncpa [#allocation6 + $0x1], 1 }
 0x387   :  { %1571 = vsyncpa [#allocation4], 1 }
 0x388   :  { %1573 = vsyncpa [#allocation4 + $0x1], 1 }

</bundles_post_ra>
